<compile_context>
chip_gen: v7x
topology: tpu7x:2x2x1
jax: 0.10.0
libtpu: 0.0.40
codegen_flags: <defaults>
</compile_context>

<pallas_src>
import functools

import jax
import jax.numpy as jnp
from jax.experimental import pallas as pl
from jax.experimental.pallas import tpu as pltpu


# ---------------------------------------------------------------------------
# Fused kernel: conv1 + BN1 + ReLU + conv2 + BN2 + residual, all in VMEM
# ---------------------------------------------------------------------------
def _fused_residual_block_kernel(x_ref, w1_ref, w2_ref, mask_ref, bn_ref, out_ref,
                                 stack_ref, hpad_ref, *, N, C, Cpad, H, W, eps):
    """Shapes (Lo = H*(W+2), Lp = (H+3)*(W+2)):
       x_ref:    (N, C, Lp)      zero-padded input, spatial flattened, f32
       w1_ref:   (C, 9*Cpad)     conv1 taps as one contraction, bf16 (zero Cin-pad cols)
       w2_ref:   (C, 9*Cpad)     conv2 taps, bf16
       mask_ref: (1, N*Lo)       1.0 on valid output columns, 0.0 on junk W-pad columns
       bn_ref:   (C, 4)          columns = [gamma1, beta1, gamma2, beta2], f32
       out_ref:  (N, C, Lo)      output (junk columns zero), f32
       stack_ref:(9*Cpad, N*Lo)  VMEM scratch: shifted-tap stack (conv matmul RHS), f32
       hpad_ref: (N, C, Lp)      VMEM scratch: BN1/ReLU output in padded layout
    """
    Wp = W + 2
    Lo = H * Wp
    count = float(N * H * W)
    mask = mask_ref[...]                                     # (1, N*Lo)

    # Zero once: tap-pad sublanes of the stack and the halos of padded-h stay 0.
    stack_ref[...] = jnp.zeros_like(stack_ref)
    hpad_ref[...] = jnp.zeros_like(hpad_ref)

    def fill_stack(src_ref):
        # src_ref: (N, C, Lp).  One (C, Lo) shifted view per tap per sample.
        for t in range(9):
            kh, kw = divmod(t, 3)
            s = kh * Wp + kw
            for n in range(N):
                stack_ref[t * Cpad:t * Cpad + C, n * Lo:(n + 1) * Lo] = \
                    src_ref[n, :, s:s + Lo]

    def conv(w_ref):
        # Single K = 9*Cpad MXU contraction (one push/pop instead of 9).
        return jnp.dot(w_ref[...], stack_ref[...].astype(jnp.bfloat16),
                       preferred_element_type=jnp.float32)   # (C, N*Lo) f32

    def bn_scale_shift(y, gamma, beta):
        # Training-mode BatchNorm statistics over the whole masked batch (f32).
        ym = y * mask
        s1 = jnp.sum(ym, axis=1, keepdims=True)              # (C, 1)
        s2 = jnp.sum(ym * ym, axis=1, keepdims=True)         # (C, 1)
        mean = s1 / count
        var = jnp.maximum(s2 / count - mean * mean, 0.0)
        scale = gamma * jax.lax.rsqrt(var + eps)
        shift = beta - mean * scale
        return scale, shift

    # ---- conv1 -> bn1 -> relu -------------------------------------------------
    fill_stack(x_ref)
    y1 = conv(w1_ref)
    sc1, sh1 = bn_scale_shift(y1, bn_ref[:, 0:1], bn_ref[:, 1:2])
    h = jnp.maximum(y1 * sc1 + sh1, 0.0) * mask              # re-mask junk columns

    # ---- re-embed h in the padded layout (single flat offset W+3; halos stay 0) ----
    for n in range(N):
        hpad_ref[n, :, W + 3:W + 3 + Lo] = h[:, n * Lo:(n + 1) * Lo]

    # ---- conv2 -> bn2 -> + residual --------------------------------------------
    fill_stack(hpad_ref)
    y2 = conv(w2_ref)
    sc2, sh2 = bn_scale_shift(y2, bn_ref[:, 2:3], bn_ref[:, 3:4])
    z = (y2 * sc2 + sh2) * mask
    for n in range(N):
        # Residual read straight from the padded input (its junk columns are 0).
        out_ref[n] = z[:, n * Lo:(n + 1) * Lo] + x_ref[n, :, W + 3:W + 3 + Lo]


# ---------------------------------------------------------------------------
# Wrapper: layout prep (one pad in, one column-drop out) + the single pallas_call
# ---------------------------------------------------------------------------
def _prep_conv_weight(w, C, Cpad):
    """(3,3,Cin,Cout) HWIO -> (Cout, 9*Cpad) bf16, tap-major columns, Cin zero-padded
    to Cpad so the in-kernel stack stores are sublane-aligned (pad rows are inert)."""
    wt = jnp.transpose(w.reshape(9, C, C), (2, 0, 1))        # (Cout, 9, Cin)
    wt = jnp.pad(wt, ((0, 0), (0, 0), (0, Cpad - C)))        # (Cout, 9, Cpad)
    return wt.reshape(C, 9 * Cpad).astype(jnp.bfloat16)


def residual_block_forward(x, params, *, eps=1e-5):
    """NCHW in / NCHW out; training-mode BatchNorm (batch statistics)."""
    N, C, H, W = x.shape
    w1, b1, g1, be1, w2, b2, g2, be2 = params
    # Conv biases are exactly cancelled by training-mode BN mean subtraction.
    del b1, b2

    Wp = W + 2
    Lo = H * Wp
    Lp = (H + 3) * Wp
    Cpad = -(-C // 8) * 8                                    # round Cin up to 8

    # Single zero-pad + flatten of the input (also serves as the residual source).
    xp = jnp.pad(x, ((0, 0), (0, 0), (1, 2), (1, 1))).reshape(N, C, Lp)
    w1s = _prep_conv_weight(w1, C, Cpad)
    w2s = _prep_conv_weight(w2, C, Cpad)
    mask = ((jnp.arange(N * Lo, dtype=jnp.int32) % Wp) < W).astype(jnp.float32)
    mask = mask.reshape(1, N * Lo)
    bnp = jnp.stack([g1, be1, g2, be2], axis=1).astype(jnp.float32)     # (C, 4)

    kernel = functools.partial(_fused_residual_block_kernel,
                               N=N, C=C, Cpad=Cpad, H=H, W=W, eps=eps)
    flops = 2 * (2 * N * H * W * 9 * C * C) + 12 * N * C * Lo
    bytes_accessed = (4 * (xp.size + mask.size + bnp.size + N * C * Lo)
                      + 2 * (w1s.size + w2s.size))

    out_flat = pl.pallas_call(
        kernel,
        grid=(1,),
        in_specs=[
            pl.BlockSpec((N, C, Lp), lambda i: (0, 0, 0)),
            pl.BlockSpec((C, 9 * Cpad), lambda i: (0, 0)),
            pl.BlockSpec((C, 9 * Cpad), lambda i: (0, 0)),
            pl.BlockSpec((1, N * Lo), lambda i: (0, 0)),
            pl.BlockSpec((C, 4), lambda i: (0, 0)),
        ],
        out_specs=pl.BlockSpec((N, C, Lo), lambda i: (0, 0, 0)),
        out_shape=jax.ShapeDtypeStruct((N, C, Lo), jnp.float32),
        scratch_shapes=[
            pltpu.VMEM((9 * Cpad, N * Lo), jnp.float32),
            pltpu.VMEM((N, C, Lp), jnp.float32),
        ],
        compiler_params=pltpu.CompilerParams(
            dimension_semantics=("arbitrary",),
            vmem_limit_bytes=32 * 1024 * 1024,
        ),
        cost_estimate=pl.CostEstimate(
            flops=flops, transcendentals=2 * C, bytes_accessed=bytes_accessed),
    )(xp, w1s, w2s, mask, bnp)

    # Single cheap XLA epilogue: drop the 2 junk columns per flattened row.
    return out_flat.reshape(N, C, H, Wp)[..., :W]


# ---------------------------------------------------------------------------
# Pure-JAX f32 reference (NCHW / HWIO), matching PyTorch training-mode BN (with bias)
# ---------------------------------------------------------------------------
def ref_forward(x, w1, b1, g1, be1, w2, b2, g2, be2, eps=1e-5):
    dn = ("NCHW", "HWIO", "NCHW")

    def conv(x, w, b):
        y = jax.lax.conv_general_dilated(
            x, w, window_strides=(1, 1), padding=((1, 1), (1, 1)),
            dimension_numbers=dn)
        return y + b.reshape(1, -1, 1, 1)

    def bn(y, g, be):
        mean = jnp.mean(y, axis=(0, 2, 3), keepdims=True)
        var = jnp.mean(jnp.square(y - mean), axis=(0, 2, 3), keepdims=True)
        return ((y - mean) * jax.lax.rsqrt(var + eps) * g.reshape(1, -1, 1, 1)
                + be.reshape(1, -1, 1, 1))

    h = jnp.maximum(bn(conv(x, w1, b1), g1, be1), 0.0)
    return bn(conv(h, w2, b2), g2, be2) + x


if __name__ == "__main__":
    N, C, H, W = 2, 4, 16, 16   # in_channels == out_channels (required for residual add)
    K = 3

    key = jax.random.PRNGKey(0)
    keys = jax.random.split(key, 9)

    # PyTorch-convention NCHW input.
    x = jax.random.normal(keys[0], (N, C, H, W), jnp.float32)

    # Deterministic synthetic parameters (shapes from the module's __init__), HWIO weights.
    w1 = 0.1 * jax.random.normal(keys[1], (K, K, C, C), jnp.float32)   # conv1.weight
    b1 = 0.1 * jax.random.normal(keys[2], (C,), jnp.float32)           # conv1.bias
    g1 = 1.0 + 0.1 * jax.random.normal(keys[3], (C,), jnp.float32)     # bn1.weight
    be1 = 0.1 * jax.random.normal(keys[4], (C,), jnp.float32)          # bn1.bias
    w2 = 0.1 * jax.random.normal(keys[5], (K, K, C, C), jnp.float32)   # conv2.weight
    b2 = 0.1 * jax.random.normal(keys[6], (C,), jnp.float32)           # conv2.bias
    g2 = 1.0 + 0.1 * jax.random.normal(keys[7], (C,), jnp.float32)     # bn2.weight
    be2 = 0.1 * jax.random.normal(keys[8], (C,), jnp.float32)          # bn2.bias
    params = (w1, b1, g1, be1, w2, b2, g2, be2)

    fwd = jax.jit(lambda xx: residual_block_forward(xx, params))
    out = jax.block_until_ready(fwd(x))

    ref = ref_forward(x, *params)
    err = float(jnp.max(jnp.abs(out - ref)))
    # bf16 MXU operands (f32 accumulation / BN math) -> tolerance loosened vs. pure f32.
    assert err < 5e-2, f"max abs error too large: {err}"
    print("KERNEL_OK")
</pallas_src>

<mosaic_0001>
module attributes {stable_mosaic.version = 11 : i64} {
  func.func @_fused_residual_block_kernel(%arg0: i32, %arg1: memref<2x4x342xf32, #tpu.memory_space<vmem>>, %arg2: memref<4x72xbf16, #tpu.memory_space<vmem>>, %arg3: memref<4x72xbf16, #tpu.memory_space<vmem>>, %arg4: memref<1x576xf32, #tpu.memory_space<vmem>>, %arg5: memref<4x4xf32, #tpu.memory_space<vmem>>, %arg6: memref<2x4x288xf32, #tpu.memory_space<vmem>>, %arg7: memref<72x576xf32, #tpu.memory_space<vmem>>, %arg8: memref<2x4x342xf32, #tpu.memory_space<vmem>>) attributes {dimension_semantics = [#tpu.dimension_semantics<arbitrary>], iteration_bounds = array<i64: 1>, scalar_prefetch = 0 : i64, scratch_operands = 2 : i64, tpu.core_type = #tpu.core_type<tc>, window_params = [{pipeline_mode = #tpu.pipeline_mode<synchronous>, transform_indices = @transform_0, window_bounds = array<i64: 2, 4, 342>}, {pipeline_mode = #tpu.pipeline_mode<synchronous>, transform_indices = @transform_1, window_bounds = array<i64: 4, 72>}, {pipeline_mode = #tpu.pipeline_mode<synchronous>, transform_indices = @transform_2, window_bounds = array<i64: 4, 72>}, {pipeline_mode = #tpu.pipeline_mode<synchronous>, transform_indices = @transform_3, window_bounds = array<i64: 1, 576>}, {pipeline_mode = #tpu.pipeline_mode<synchronous>, transform_indices = @transform_4, window_bounds = array<i64: 4, 4>}, {pipeline_mode = #tpu.pipeline_mode<synchronous>, transform_indices = @transform_5, window_bounds = array<i64: 2, 4, 288>}]} {
    %c0 = arith.constant 0 : index
    %c0_0 = arith.constant 0 : index
    %0 = vector.load %arg4[%c0, %c0_0] : memref<1x576xf32, #tpu.memory_space<vmem>>, vector<1x576xf32>
    %cst = arith.constant 0.000000e+00 : f32
    %1 = vector.broadcast %cst : f32 to vector<72x576xf32>
    %c0_1 = arith.constant 0 : index
    %c0_2 = arith.constant 0 : index
    %2 = vector.load %arg7[%c0_1, %c0_2] : memref<72x576xf32, #tpu.memory_space<vmem>>, vector<72x576xf32>
    tpu.vector_store %arg7[%c0_1, %c0_2], %1 {strides = array<i32>} : memref<72x576xf32, #tpu.memory_space<vmem>>, vector<72x576xf32>,
    %cst_3 = arith.constant 0.000000e+00 : f32
    %3 = vector.broadcast %cst_3 : f32 to vector<2x4x342xf32>
    %c0_4 = arith.constant 0 : index
    %c0_5 = arith.constant 0 : index
    %c0_6 = arith.constant 0 : index
    %4 = vector.load %arg8[%c0_4, %c0_5, %c0_6] : memref<2x4x342xf32, #tpu.memory_space<vmem>>, vector<2x4x342xf32>
    tpu.vector_store %arg8[%c0_4, %c0_5, %c0_6], %3 {strides = array<i32>} : memref<2x4x342xf32, #tpu.memory_space<vmem>>, vector<2x4x342xf32>,
    %c0_7 = arith.constant 0 : index
    %c0_8 = arith.constant 0 : index
    %c0_9 = arith.constant 0 : index
    %5 = vector.load %arg1[%c0_7, %c0_8, %c0_9] : memref<2x4x342xf32, #tpu.memory_space<vmem>>, vector<1x4x288xf32>
    %6 = vector.shape_cast %5 : vector<1x4x288xf32> to vector<4x288xf32>
    %c0_10 = arith.constant 0 : index
    %c0_11 = arith.constant 0 : index
    %7 = vector.load %arg7[%c0_10, %c0_11] : memref<72x576xf32, #tpu.memory_space<vmem>>, vector<4x288xf32>
    tpu.vector_store %arg7[%c0_10, %c0_11], %6 {strides = array<i32>} : memref<72x576xf32, #tpu.memory_space<vmem>>, vector<4x288xf32>,
    %c1 = arith.constant 1 : index
    %c0_12 = arith.constant 0 : index
    %c0_13 = arith.constant 0 : index
    %8 = vector.load %arg1[%c1, %c0_12, %c0_13] : memref<2x4x342xf32, #tpu.memory_space<vmem>>, vector<1x4x288xf32>
    %9 = vector.shape_cast %8 : vector<1x4x288xf32> to vector<4x288xf32>
    %c0_14 = arith.constant 0 : index
    %c288 = arith.constant 288 : index
    %10 = vector.load %arg7[%c0_14, %c288] : memref<72x576xf32, #tpu.memory_space<vmem>>, vector<4x288xf32>
    tpu.vector_store %arg7[%c0_14, %c288], %9 {strides = array<i32>} : memref<72x576xf32, #tpu.memory_space<vmem>>, vector<4x288xf32>,
    %c0_15 = arith.constant 0 : index
    %c0_16 = arith.constant 0 : index
    %c1_17 = arith.constant 1 : index
    %11 = vector.load %arg1[%c0_15, %c0_16, %c1_17] : memref<2x4x342xf32, #tpu.memory_space<vmem>>, vector<1x4x288xf32>
    %12 = vector.shape_cast %11 : vector<1x4x288xf32> to vector<4x288xf32>
    %c8 = arith.constant 8 : index
    %c0_18 = arith.constant 0 : index
    %13 = vector.load %arg7[%c8, %c0_18] : memref<72x576xf32, #tpu.memory_space<vmem>>, vector<4x288xf32>
    tpu.vector_store %arg7[%c8, %c0_18], %12 {strides = array<i32>} : memref<72x576xf32, #tpu.memory_space<vmem>>, vector<4x288xf32>,
    %c1_19 = arith.constant 1 : index
    %c0_20 = arith.constant 0 : index
    %c1_21 = arith.constant 1 : index
    %14 = vector.load %arg1[%c1_19, %c0_20, %c1_21] : memref<2x4x342xf32, #tpu.memory_space<vmem>>, vector<1x4x288xf32>
    %15 = vector.shape_cast %14 : vector<1x4x288xf32> to vector<4x288xf32>
    %c8_22 = arith.constant 8 : index
    %c288_23 = arith.constant 288 : index
    %16 = vector.load %arg7[%c8_22, %c288_23] : memref<72x576xf32, #tpu.memory_space<vmem>>, vector<4x288xf32>
    tpu.vector_store %arg7[%c8_22, %c288_23], %15 {strides = array<i32>} : memref<72x576xf32, #tpu.memory_space<vmem>>, vector<4x288xf32>,
    %c0_24 = arith.constant 0 : index
    %c0_25 = arith.constant 0 : index
    %c2 = arith.constant 2 : index
    %17 = vector.load %arg1[%c0_24, %c0_25, %c2] : memref<2x4x342xf32, #tpu.memory_space<vmem>>, vector<1x4x288xf32>
    %18 = vector.shape_cast %17 : vector<1x4x288xf32> to vector<4x288xf32>
    %c16 = arith.constant 16 : index
    %c0_26 = arith.constant 0 : index
    %19 = vector.load %arg7[%c16, %c0_26] : memref<72x576xf32, #tpu.memory_space<vmem>>, vector<4x288xf32>
    tpu.vector_store %arg7[%c16, %c0_26], %18 {strides = array<i32>} : memref<72x576xf32, #tpu.memory_space<vmem>>, vector<4x288xf32>,
    %c1_27 = arith.constant 1 : index
    %c0_28 = arith.constant 0 : index
    %c2_29 = arith.constant 2 : index
    %20 = vector.load %arg1[%c1_27, %c0_28, %c2_29] : memref<2x4x342xf32, #tpu.memory_space<vmem>>, vector<1x4x288xf32>
    %21 = vector.shape_cast %20 : vector<1x4x288xf32> to vector<4x288xf32>
    %c16_30 = arith.constant 16 : index
    %c288_31 = arith.constant 288 : index
    %22 = vector.load %arg7[%c16_30, %c288_31] : memref<72x576xf32, #tpu.memory_space<vmem>>, vector<4x288xf32>
    tpu.vector_store %arg7[%c16_30, %c288_31], %21 {strides = array<i32>} : memref<72x576xf32, #tpu.memory_space<vmem>>, vector<4x288xf32>,
    %c0_32 = arith.constant 0 : index
    %c0_33 = arith.constant 0 : index
    %c18 = arith.constant 18 : index
    %23 = vector.load %arg1[%c0_32, %c0_33, %c18] : memref<2x4x342xf32, #tpu.memory_space<vmem>>, vector<1x4x288xf32>
    %24 = vector.shape_cast %23 : vector<1x4x288xf32> to vector<4x288xf32>
    %c24 = arith.constant 24 : index
    %c0_34 = arith.constant 0 : index
    %25 = vector.load %arg7[%c24, %c0_34] : memref<72x576xf32, #tpu.memory_space<vmem>>, vector<4x288xf32>
    tpu.vector_store %arg7[%c24, %c0_34], %24 {strides = array<i32>} : memref<72x576xf32, #tpu.memory_space<vmem>>, vector<4x288xf32>,
    %c1_35 = arith.constant 1 : index
    %c0_36 = arith.constant 0 : index
    %c18_37 = arith.constant 18 : index
    %26 = vector.load %arg1[%c1_35, %c0_36, %c18_37] : memref<2x4x342xf32, #tpu.memory_space<vmem>>, vector<1x4x288xf32>
    %27 = vector.shape_cast %26 : vector<1x4x288xf32> to vector<4x288xf32>
    %c24_38 = arith.constant 24 : index
    %c288_39 = arith.constant 288 : index
    %28 = vector.load %arg7[%c24_38, %c288_39] : memref<72x576xf32, #tpu.memory_space<vmem>>, vector<4x288xf32>
    tpu.vector_store %arg7[%c24_38, %c288_39], %27 {strides = array<i32>} : memref<72x576xf32, #tpu.memory_space<vmem>>, vector<4x288xf32>,
    %c0_40 = arith.constant 0 : index
    %c0_41 = arith.constant 0 : index
    %c19 = arith.constant 19 : index
    %29 = vector.load %arg1[%c0_40, %c0_41, %c19] : memref<2x4x342xf32, #tpu.memory_space<vmem>>, vector<1x4x288xf32>
    %30 = vector.shape_cast %29 : vector<1x4x288xf32> to vector<4x288xf32>
    %c32 = arith.constant 32 : index
    %c0_42 = arith.constant 0 : index
    %31 = vector.load %arg7[%c32, %c0_42] : memref<72x576xf32, #tpu.memory_space<vmem>>, vector<4x288xf32>
    tpu.vector_store %arg7[%c32, %c0_42], %30 {strides = array<i32>} : memref<72x576xf32, #tpu.memory_space<vmem>>, vector<4x288xf32>,
    %c1_43 = arith.constant 1 : index
    %c0_44 = arith.constant 0 : index
    %c19_45 = arith.constant 19 : index
    %32 = vector.load %arg1[%c1_43, %c0_44, %c19_45] : memref<2x4x342xf32, #tpu.memory_space<vmem>>, vector<1x4x288xf32>
    %33 = vector.shape_cast %32 : vector<1x4x288xf32> to vector<4x288xf32>
    %c32_46 = arith.constant 32 : index
    %c288_47 = arith.constant 288 : index
    %34 = vector.load %arg7[%c32_46, %c288_47] : memref<72x576xf32, #tpu.memory_space<vmem>>, vector<4x288xf32>
    tpu.vector_store %arg7[%c32_46, %c288_47], %33 {strides = array<i32>} : memref<72x576xf32, #tpu.memory_space<vmem>>, vector<4x288xf32>,
    %c0_48 = arith.constant 0 : index
    %c0_49 = arith.constant 0 : index
    %c20 = arith.constant 20 : index
    %35 = vector.load %arg1[%c0_48, %c0_49, %c20] : memref<2x4x342xf32, #tpu.memory_space<vmem>>, vector<1x4x288xf32>
    %36 = vector.shape_cast %35 : vector<1x4x288xf32> to vector<4x288xf32>
    %c40 = arith.constant 40 : index
    %c0_50 = arith.constant 0 : index
    %37 = vector.load %arg7[%c40, %c0_50] : memref<72x576xf32, #tpu.memory_space<vmem>>, vector<4x288xf32>
    tpu.vector_store %arg7[%c40, %c0_50], %36 {strides = array<i32>} : memref<72x576xf32, #tpu.memory_space<vmem>>, vector<4x288xf32>,
    %c1_51 = arith.constant 1 : index
    %c0_52 = arith.constant 0 : index
    %c20_53 = arith.constant 20 : index
    %38 = vector.load %arg1[%c1_51, %c0_52, %c20_53] : memref<2x4x342xf32, #tpu.memory_space<vmem>>, vector<1x4x288xf32>
    %39 = vector.shape_cast %38 : vector<1x4x288xf32> to vector<4x288xf32>
    %c40_54 = arith.constant 40 : index
    %c288_55 = arith.constant 288 : index
    %40 = vector.load %arg7[%c40_54, %c288_55] : memref<72x576xf32, #tpu.memory_space<vmem>>, vector<4x288xf32>
    tpu.vector_store %arg7[%c40_54, %c288_55], %39 {strides = array<i32>} : memref<72x576xf32, #tpu.memory_space<vmem>>, vector<4x288xf32>,
    %c0_56 = arith.constant 0 : index
    %c0_57 = arith.constant 0 : index
    %c36 = arith.constant 36 : index
    %41 = vector.load %arg1[%c0_56, %c0_57, %c36] : memref<2x4x342xf32, #tpu.memory_space<vmem>>, vector<1x4x288xf32>
    %42 = vector.shape_cast %41 : vector<1x4x288xf32> to vector<4x288xf32>
    %c48 = arith.constant 48 : index
    %c0_58 = arith.constant 0 : index
    %43 = vector.load %arg7[%c48, %c0_58] : memref<72x576xf32, #tpu.memory_space<vmem>>, vector<4x288xf32>
    tpu.vector_store %arg7[%c48, %c0_58], %42 {strides = array<i32>} : memref<72x576xf32, #tpu.memory_space<vmem>>, vector<4x288xf32>,
    %c1_59 = arith.constant 1 : index
    %c0_60 = arith.constant 0 : index
    %c36_61 = arith.constant 36 : index
    %44 = vector.load %arg1[%c1_59, %c0_60, %c36_61] : memref<2x4x342xf32, #tpu.memory_space<vmem>>, vector<1x4x288xf32>
    %45 = vector.shape_cast %44 : vector<1x4x288xf32> to vector<4x288xf32>
    %c48_62 = arith.constant 48 : index
    %c288_63 = arith.constant 288 : index
    %46 = vector.load %arg7[%c48_62, %c288_63] : memref<72x576xf32, #tpu.memory_space<vmem>>, vector<4x288xf32>
    tpu.vector_store %arg7[%c48_62, %c288_63], %45 {strides = array<i32>} : memref<72x576xf32, #tpu.memory_space<vmem>>, vector<4x288xf32>,
    %c0_64 = arith.constant 0 : index
    %c0_65 = arith.constant 0 : index
    %c37 = arith.constant 37 : index
    %47 = vector.load %arg1[%c0_64, %c0_65, %c37] : memref<2x4x342xf32, #tpu.memory_space<vmem>>, vector<1x4x288xf32>
    %48 = vector.shape_cast %47 : vector<1x4x288xf32> to vector<4x288xf32>
    %c56 = arith.constant 56 : index
    %c0_66 = arith.constant 0 : index
    %49 = vector.load %arg7[%c56, %c0_66] : memref<72x576xf32, #tpu.memory_space<vmem>>, vector<4x288xf32>
    tpu.vector_store %arg7[%c56, %c0_66], %48 {strides = array<i32>} : memref<72x576xf32, #tpu.memory_space<vmem>>, vector<4x288xf32>,
    %c1_67 = arith.constant 1 : index
    %c0_68 = arith.constant 0 : index
    %c37_69 = arith.constant 37 : index
    %50 = vector.load %arg1[%c1_67, %c0_68, %c37_69] : memref<2x4x342xf32, #tpu.memory_space<vmem>>, vector<1x4x288xf32>
    %51 = vector.shape_cast %50 : vector<1x4x288xf32> to vector<4x288xf32>
    %c56_70 = arith.constant 56 : index
    %c288_71 = arith.constant 288 : index
    %52 = vector.load %arg7[%c56_70, %c288_71] : memref<72x576xf32, #tpu.memory_space<vmem>>, vector<4x288xf32>
    tpu.vector_store %arg7[%c56_70, %c288_71], %51 {strides = array<i32>} : memref<72x576xf32, #tpu.memory_space<vmem>>, vector<4x288xf32>,
    %c0_72 = arith.constant 0 : index
    %c0_73 = arith.constant 0 : index
    %c38 = arith.constant 38 : index
    %53 = vector.load %arg1[%c0_72, %c0_73, %c38] : memref<2x4x342xf32, #tpu.memory_space<vmem>>, vector<1x4x288xf32>
    %54 = vector.shape_cast %53 : vector<1x4x288xf32> to vector<4x288xf32>
    %c64 = arith.constant 64 : index
    %c0_74 = arith.constant 0 : index
    %55 = vector.load %arg7[%c64, %c0_74] : memref<72x576xf32, #tpu.memory_space<vmem>>, vector<4x288xf32>
    tpu.vector_store %arg7[%c64, %c0_74], %54 {strides = array<i32>} : memref<72x576xf32, #tpu.memory_space<vmem>>, vector<4x288xf32>,
    %c1_75 = arith.constant 1 : index
    %c0_76 = arith.constant 0 : index
    %c38_77 = arith.constant 38 : index
    %56 = vector.load %arg1[%c1_75, %c0_76, %c38_77] : memref<2x4x342xf32, #tpu.memory_space<vmem>>, vector<1x4x288xf32>
    %57 = vector.shape_cast %56 : vector<1x4x288xf32> to vector<4x288xf32>
    %c64_78 = arith.constant 64 : index
    %c288_79 = arith.constant 288 : index
    %58 = vector.load %arg7[%c64_78, %c288_79] : memref<72x576xf32, #tpu.memory_space<vmem>>, vector<4x288xf32>
    tpu.vector_store %arg7[%c64_78, %c288_79], %57 {strides = array<i32>} : memref<72x576xf32, #tpu.memory_space<vmem>>, vector<4x288xf32>,
    %c0_80 = arith.constant 0 : index
    %c0_81 = arith.constant 0 : index
    %59 = vector.load %arg2[%c0_80, %c0_81] : memref<4x72xbf16, #tpu.memory_space<vmem>>, vector<4x72xbf16>
    %c0_82 = arith.constant 0 : index
    %c0_83 = arith.constant 0 : index
    %60 = vector.load %arg7[%c0_82, %c0_83] : memref<72x576xf32, #tpu.memory_space<vmem>>, vector<72x576xf32>
    %61 = arith.truncf %60 : vector<72x576xf32> to vector<72x576xbf16>
    %cst_84 = arith.constant dense<0.000000e+00> : vector<4x576xf32>
    %62 = tpu.matmul %59, %61, %cst_84 {dimension_numbers = #tpu.dot_dimension_numbers<[1], [0], [0], [1], [0, 0, 1, 1], [], []>} : vector<4x72xbf16>, vector<72x576xbf16>, vector<4x576xf32> -> vector<4x576xf32>
    %c0_85 = arith.constant 0 : index
    %c0_86 = arith.constant 0 : index
    %63 = vector.load %arg5[%c0_85, %c0_86] : memref<4x4xf32, #tpu.memory_space<vmem>>, vector<4x1xf32>
    %c0_87 = arith.constant 0 : index
    %c1_88 = arith.constant 1 : index
    %64 = vector.load %arg5[%c0_87, %c1_88] : memref<4x4xf32, #tpu.memory_space<vmem>>, vector<4x1xf32>
    %65 = vector.broadcast %0 : vector<1x576xf32> to vector<4x576xf32>
    %66 = arith.mulf %62, %65 : vector<4x576xf32>
    %cst_89 = arith.constant dense<0.000000e+00> : vector<4xf32>
    %67 = vector.multi_reduction <add>, %66, %cst_89 [1] : vector<4x576xf32> to vector<4xf32>
    %68 = vector.shape_cast %67 : vector<4xf32> to vector<4x1xf32>
    %69 = arith.mulf %66, %66 : vector<4x576xf32>
    %cst_90 = arith.constant dense<0.000000e+00> : vector<4xf32>
    %70 = vector.multi_reduction <add>, %69, %cst_90 [1] : vector<4x576xf32> to vector<4xf32>
    %71 = vector.shape_cast %70 : vector<4xf32> to vector<4x1xf32>
    %cst_91 = arith.constant 5.120000e+02 : f32
    %72 = vector.broadcast %cst_91 : f32 to vector<4x1xf32>
    %73 = arith.divf %68, %72 : vector<4x1xf32>
    %cst_92 = arith.constant 5.120000e+02 : f32
    %74 = vector.broadcast %cst_92 : f32 to vector<4x1xf32>
    %75 = arith.divf %71, %74 : vector<4x1xf32>
    %76 = arith.mulf %73, %73 : vector<4x1xf32>
    %77 = arith.subf %75, %76 : vector<4x1xf32>
    %cst_93 = arith.constant 0.000000e+00 : f32
    %78 = vector.broadcast %cst_93 : f32 to vector<4x1xf32>
    %79 = arith.maximumf %77, %78 : vector<4x1xf32>
    %cst_94 = arith.constant 9.99999974E-6 : f32
    %80 = vector.broadcast %cst_94 : f32 to vector<4x1xf32>
    %81 = arith.addf %79, %80 : vector<4x1xf32>
    %82 = math.rsqrt %81 : vector<4x1xf32>
    %83 = arith.mulf %63, %82 : vector<4x1xf32>
    %84 = arith.mulf %73, %83 : vector<4x1xf32>
    %85 = arith.subf %64, %84 : vector<4x1xf32>
    %86 = vector.broadcast %83 : vector<4x1xf32> to vector<4x576xf32>
    %87 = arith.mulf %62, %86 : vector<4x576xf32>
    %88 = vector.broadcast %85 : vector<4x1xf32> to vector<4x576xf32>
    %89 = arith.addf %87, %88 : vector<4x576xf32>
    %cst_95 = arith.constant 0.000000e+00 : f32
    %90 = vector.broadcast %cst_95 : f32 to vector<4x576xf32>
    %91 = arith.maximumf %89, %90 : vector<4x576xf32>
    %92 = vector.broadcast %0 : vector<1x576xf32> to vector<4x576xf32>
    %93 = arith.mulf %91, %92 : vector<4x576xf32>
    %94 = vector.extract_strided_slice %93 {offsets = [0, 0], sizes = [4, 288], strides = [1, 1]} : vector<4x576xf32> to vector<4x288xf32>
    %c0_96 = arith.constant 0 : index
    %c0_97 = arith.constant 0 : index
    %c19_98 = arith.constant 19 : index
    %95 = vector.load %arg8[%c0_96, %c0_97, %c19_98] : memref<2x4x342xf32, #tpu.memory_space<vmem>>, vector<1x4x288xf32>
    %96 = vector.shape_cast %95 : vector<1x4x288xf32> to vector<4x288xf32>
    %97 = vector.shape_cast %94 : vector<4x288xf32> to vector<1x4x288xf32>
    tpu.vector_store %arg8[%c0_96, %c0_97, %c19_98], %97 {strides = array<i32>} : memref<2x4x342xf32, #tpu.memory_space<vmem>>, vector<1x4x288xf32>,
    %98 = vector.extract_strided_slice %93 {offsets = [0, 288], sizes = [4, 288], strides = [1, 1]} : vector<4x576xf32> to vector<4x288xf32>
    %c1_99 = arith.constant 1 : index
    %c0_100 = arith.constant 0 : index
    %c19_101 = arith.constant 19 : index
    %99 = vector.load %arg8[%c1_99, %c0_100, %c19_101] : memref<2x4x342xf32, #tpu.memory_space<vmem>>, vector<1x4x288xf32>
    %100 = vector.shape_cast %99 : vector<1x4x288xf32> to vector<4x288xf32>
    %101 = vector.shape_cast %98 : vector<4x288xf32> to vector<1x4x288xf32>
    tpu.vector_store %arg8[%c1_99, %c0_100, %c19_101], %101 {strides = array<i32>} : memref<2x4x342xf32, #tpu.memory_space<vmem>>, vector<1x4x288xf32>,
    %c0_102 = arith.constant 0 : index
    %c0_103 = arith.constant 0 : index
    %c0_104 = arith.constant 0 : index
    %102 = vector.load %arg8[%c0_102, %c0_103, %c0_104] : memref<2x4x342xf32, #tpu.memory_space<vmem>>, vector<1x4x288xf32>
    %103 = vector.shape_cast %102 : vector<1x4x288xf32> to vector<4x288xf32>
    %c0_105 = arith.constant 0 : index
    %c0_106 = arith.constant 0 : index
    %104 = vector.load %arg7[%c0_105, %c0_106] : memref<72x576xf32, #tpu.memory_space<vmem>>, vector<4x288xf32>
    tpu.vector_store %arg7[%c0_105, %c0_106], %103 {strides = array<i32>} : memref<72x576xf32, #tpu.memory_space<vmem>>, vector<4x288xf32>,
    %c1_107 = arith.constant 1 : index
    %c0_108 = arith.constant 0 : index
    %c0_109 = arith.constant 0 : index
    %105 = vector.load %arg8[%c1_107, %c0_108, %c0_109] : memref<2x4x342xf32, #tpu.memory_space<vmem>>, vector<1x4x288xf32>
    %106 = vector.shape_cast %105 : vector<1x4x288xf32> to vector<4x288xf32>
    %c0_110 = arith.constant 0 : index
    %c288_111 = arith.constant 288 : index
    %107 = vector.load %arg7[%c0_110, %c288_111] : memref<72x576xf32, #tpu.memory_space<vmem>>, vector<4x288xf32>
    tpu.vector_store %arg7[%c0_110, %c288_111], %106 {strides = array<i32>} : memref<72x576xf32, #tpu.memory_space<vmem>>, vector<4x288xf32>,
    %c0_112 = arith.constant 0 : index
    %c0_113 = arith.constant 0 : index
    %c1_114 = arith.constant 1 : index
    %108 = vector.load %arg8[%c0_112, %c0_113, %c1_114] : memref<2x4x342xf32, #tpu.memory_space<vmem>>, vector<1x4x288xf32>
    %109 = vector.shape_cast %108 : vector<1x4x288xf32> to vector<4x288xf32>
    %c8_115 = arith.constant 8 : index
    %c0_116 = arith.constant 0 : index
    %110 = vector.load %arg7[%c8_115, %c0_116] : memref<72x576xf32, #tpu.memory_space<vmem>>, vector<4x288xf32>
    tpu.vector_store %arg7[%c8_115, %c0_116], %109 {strides = array<i32>} : memref<72x576xf32, #tpu.memory_space<vmem>>, vector<4x288xf32>,
    %c1_117 = arith.constant 1 : index
    %c0_118 = arith.constant 0 : index
    %c1_119 = arith.constant 1 : index
    %111 = vector.load %arg8[%c1_117, %c0_118, %c1_119] : memref<2x4x342xf32, #tpu.memory_space<vmem>>, vector<1x4x288xf32>
    %112 = vector.shape_cast %111 : vector<1x4x288xf32> to vector<4x288xf32>
    %c8_120 = arith.constant 8 : index
    %c288_121 = arith.constant 288 : index
    %113 = vector.load %arg7[%c8_120, %c288_121] : memref<72x576xf32, #tpu.memory_space<vmem>>, vector<4x288xf32>
    tpu.vector_store %arg7[%c8_120, %c288_121], %112 {strides = array<i32>} : memref<72x576xf32, #tpu.memory_space<vmem>>, vector<4x288xf32>,
    %c0_122 = arith.constant 0 : index
    %c0_123 = arith.constant 0 : index
    %c2_124 = arith.constant 2 : index
    %114 = vector.load %arg8[%c0_122, %c0_123, %c2_124] : memref<2x4x342xf32, #tpu.memory_space<vmem>>, vector<1x4x288xf32>
    %115 = vector.shape_cast %114 : vector<1x4x288xf32> to vector<4x288xf32>
    %c16_125 = arith.constant 16 : index
    %c0_126 = arith.constant 0 : index
    %116 = vector.load %arg7[%c16_125, %c0_126] : memref<72x576xf32, #tpu.memory_space<vmem>>, vector<4x288xf32>
    tpu.vector_store %arg7[%c16_125, %c0_126], %115 {strides = array<i32>} : memref<72x576xf32, #tpu.memory_space<vmem>>, vector<4x288xf32>,
    %c1_127 = arith.constant 1 : index
    %c0_128 = arith.constant 0 : index
    %c2_129 = arith.constant 2 : index
    %117 = vector.load %arg8[%c1_127, %c0_128, %c2_129] : memref<2x4x342xf32, #tpu.memory_space<vmem>>, vector<1x4x288xf32>
    %118 = vector.shape_cast %117 : vector<1x4x288xf32> to vector<4x288xf32>
    %c16_130 = arith.constant 16 : index
    %c288_131 = arith.constant 288 : index
    %119 = vector.load %arg7[%c16_130, %c288_131] : memref<72x576xf32, #tpu.memory_space<vmem>>, vector<4x288xf32>
    tpu.vector_store %arg7[%c16_130, %c288_131], %118 {strides = array<i32>} : memref<72x576xf32, #tpu.memory_space<vmem>>, vector<4x288xf32>,
    %c0_132 = arith.constant 0 : index
    %c0_133 = arith.constant 0 : index
    %c18_134 = arith.constant 18 : index
    %120 = vector.load %arg8[%c0_132, %c0_133, %c18_134] : memref<2x4x342xf32, #tpu.memory_space<vmem>>, vector<1x4x288xf32>
    %121 = vector.shape_cast %120 : vector<1x4x288xf32> to vector<4x288xf32>
    %c24_135 = arith.constant 24 : index
    %c0_136 = arith.constant 0 : index
    %122 = vector.load %arg7[%c24_135, %c0_136] : memref<72x576xf32, #tpu.memory_space<vmem>>, vector<4x288xf32>
    tpu.vector_store %arg7[%c24_135, %c0_136], %121 {strides = array<i32>} : memref<72x576xf32, #tpu.memory_space<vmem>>, vector<4x288xf32>,
    %c1_137 = arith.constant 1 : index
    %c0_138 = arith.constant 0 : index
    %c18_139 = arith.constant 18 : index
    %123 = vector.load %arg8[%c1_137, %c0_138, %c18_139] : memref<2x4x342xf32, #tpu.memory_space<vmem>>, vector<1x4x288xf32>
    %124 = vector.shape_cast %123 : vector<1x4x288xf32> to vector<4x288xf32>
    %c24_140 = arith.constant 24 : index
    %c288_141 = arith.constant 288 : index
    %125 = vector.load %arg7[%c24_140, %c288_141] : memref<72x576xf32, #tpu.memory_space<vmem>>, vector<4x288xf32>
    tpu.vector_store %arg7[%c24_140, %c288_141], %124 {strides = array<i32>} : memref<72x576xf32, #tpu.memory_space<vmem>>, vector<4x288xf32>,
    %c0_142 = arith.constant 0 : index
    %c0_143 = arith.constant 0 : index
    %c19_144 = arith.constant 19 : index
    %126 = vector.load %arg8[%c0_142, %c0_143, %c19_144] : memref<2x4x342xf32, #tpu.memory_space<vmem>>, vector<1x4x288xf32>
    %127 = vector.shape_cast %126 : vector<1x4x288xf32> to vector<4x288xf32>
    %c32_145 = arith.constant 32 : index
    %c0_146 = arith.constant 0 : index
    %128 = vector.load %arg7[%c32_145, %c0_146] : memref<72x576xf32, #tpu.memory_space<vmem>>, vector<4x288xf32>
    tpu.vector_store %arg7[%c32_145, %c0_146], %127 {strides = array<i32>} : memref<72x576xf32, #tpu.memory_space<vmem>>, vector<4x288xf32>,
    %c1_147 = arith.constant 1 : index
    %c0_148 = arith.constant 0 : index
    %c19_149 = arith.constant 19 : index
    %129 = vector.load %arg8[%c1_147, %c0_148, %c19_149] : memref<2x4x342xf32, #tpu.memory_space<vmem>>, vector<1x4x288xf32>
    %130 = vector.shape_cast %129 : vector<1x4x288xf32> to vector<4x288xf32>
    %c32_150 = arith.constant 32 : index
    %c288_151 = arith.constant 288 : index
    %131 = vector.load %arg7[%c32_150, %c288_151] : memref<72x576xf32, #tpu.memory_space<vmem>>, vector<4x288xf32>
    tpu.vector_store %arg7[%c32_150, %c288_151], %130 {strides = array<i32>} : memref<72x576xf32, #tpu.memory_space<vmem>>, vector<4x288xf32>,
    %c0_152 = arith.constant 0 : index
    %c0_153 = arith.constant 0 : index
    %c20_154 = arith.constant 20 : index
    %132 = vector.load %arg8[%c0_152, %c0_153, %c20_154] : memref<2x4x342xf32, #tpu.memory_space<vmem>>, vector<1x4x288xf32>
    %133 = vector.shape_cast %132 : vector<1x4x288xf32> to vector<4x288xf32>
    %c40_155 = arith.constant 40 : index
    %c0_156 = arith.constant 0 : index
    %134 = vector.load %arg7[%c40_155, %c0_156] : memref<72x576xf32, #tpu.memory_space<vmem>>, vector<4x288xf32>
    tpu.vector_store %arg7[%c40_155, %c0_156], %133 {strides = array<i32>} : memref<72x576xf32, #tpu.memory_space<vmem>>, vector<4x288xf32>,
    %c1_157 = arith.constant 1 : index
    %c0_158 = arith.constant 0 : index
    %c20_159 = arith.constant 20 : index
    %135 = vector.load %arg8[%c1_157, %c0_158, %c20_159] : memref<2x4x342xf32, #tpu.memory_space<vmem>>, vector<1x4x288xf32>
    %136 = vector.shape_cast %135 : vector<1x4x288xf32> to vector<4x288xf32>
    %c40_160 = arith.constant 40 : index
    %c288_161 = arith.constant 288 : index
    %137 = vector.load %arg7[%c40_160, %c288_161] : memref<72x576xf32, #tpu.memory_space<vmem>>, vector<4x288xf32>
    tpu.vector_store %arg7[%c40_160, %c288_161], %136 {strides = array<i32>} : memref<72x576xf32, #tpu.memory_space<vmem>>, vector<4x288xf32>,
    %c0_162 = arith.constant 0 : index
    %c0_163 = arith.constant 0 : index
    %c36_164 = arith.constant 36 : index
    %138 = vector.load %arg8[%c0_162, %c0_163, %c36_164] : memref<2x4x342xf32, #tpu.memory_space<vmem>>, vector<1x4x288xf32>
    %139 = vector.shape_cast %138 : vector<1x4x288xf32> to vector<4x288xf32>
    %c48_165 = arith.constant 48 : index
    %c0_166 = arith.constant 0 : index
    %140 = vector.load %arg7[%c48_165, %c0_166] : memref<72x576xf32, #tpu.memory_space<vmem>>, vector<4x288xf32>
    tpu.vector_store %arg7[%c48_165, %c0_166], %139 {strides = array<i32>} : memref<72x576xf32, #tpu.memory_space<vmem>>, vector<4x288xf32>,
    %c1_167 = arith.constant 1 : index
    %c0_168 = arith.constant 0 : index
    %c36_169 = arith.constant 36 : index
    %141 = vector.load %arg8[%c1_167, %c0_168, %c36_169] : memref<2x4x342xf32, #tpu.memory_space<vmem>>, vector<1x4x288xf32>
    %142 = vector.shape_cast %141 : vector<1x4x288xf32> to vector<4x288xf32>
    %c48_170 = arith.constant 48 : index
    %c288_171 = arith.constant 288 : index
    %143 = vector.load %arg7[%c48_170, %c288_171] : memref<72x576xf32, #tpu.memory_space<vmem>>, vector<4x288xf32>
    tpu.vector_store %arg7[%c48_170, %c288_171], %142 {strides = array<i32>} : memref<72x576xf32, #tpu.memory_space<vmem>>, vector<4x288xf32>,
    %c0_172 = arith.constant 0 : index
    %c0_173 = arith.constant 0 : index
    %c37_174 = arith.constant 37 : index
    %144 = vector.load %arg8[%c0_172, %c0_173, %c37_174] : memref<2x4x342xf32, #tpu.memory_space<vmem>>, vector<1x4x288xf32>
    %145 = vector.shape_cast %144 : vector<1x4x288xf32> to vector<4x288xf32>
    %c56_175 = arith.constant 56 : index
    %c0_176 = arith.constant 0 : index
    %146 = vector.load %arg7[%c56_175, %c0_176] : memref<72x576xf32, #tpu.memory_space<vmem>>, vector<4x288xf32>
    tpu.vector_store %arg7[%c56_175, %c0_176], %145 {strides = array<i32>} : memref<72x576xf32, #tpu.memory_space<vmem>>, vector<4x288xf32>,
    %c1_177 = arith.constant 1 : index
    %c0_178 = arith.constant 0 : index
    %c37_179 = arith.constant 37 : index
    %147 = vector.load %arg8[%c1_177, %c0_178, %c37_179] : memref<2x4x342xf32, #tpu.memory_space<vmem>>, vector<1x4x288xf32>
    %148 = vector.shape_cast %147 : vector<1x4x288xf32> to vector<4x288xf32>
    %c56_180 = arith.constant 56 : index
    %c288_181 = arith.constant 288 : index
    %149 = vector.load %arg7[%c56_180, %c288_181] : memref<72x576xf32, #tpu.memory_space<vmem>>, vector<4x288xf32>
    tpu.vector_store %arg7[%c56_180, %c288_181], %148 {strides = array<i32>} : memref<72x576xf32, #tpu.memory_space<vmem>>, vector<4x288xf32>,
    %c0_182 = arith.constant 0 : index
    %c0_183 = arith.constant 0 : index
    %c38_184 = arith.constant 38 : index
    %150 = vector.load %arg8[%c0_182, %c0_183, %c38_184] : memref<2x4x342xf32, #tpu.memory_space<vmem>>, vector<1x4x288xf32>
    %151 = vector.shape_cast %150 : vector<1x4x288xf32> to vector<4x288xf32>
    %c64_185 = arith.constant 64 : index
    %c0_186 = arith.constant 0 : index
    %152 = vector.load %arg7[%c64_185, %c0_186] : memref<72x576xf32, #tpu.memory_space<vmem>>, vector<4x288xf32>
    tpu.vector_store %arg7[%c64_185, %c0_186], %151 {strides = array<i32>} : memref<72x576xf32, #tpu.memory_space<vmem>>, vector<4x288xf32>,
    %c1_187 = arith.constant 1 : index
    %c0_188 = arith.constant 0 : index
    %c38_189 = arith.constant 38 : index
    %153 = vector.load %arg8[%c1_187, %c0_188, %c38_189] : memref<2x4x342xf32, #tpu.memory_space<vmem>>, vector<1x4x288xf32>
    %154 = vector.shape_cast %153 : vector<1x4x288xf32> to vector<4x288xf32>
    %c64_190 = arith.constant 64 : index
    %c288_191 = arith.constant 288 : index
    %155 = vector.load %arg7[%c64_190, %c288_191] : memref<72x576xf32, #tpu.memory_space<vmem>>, vector<4x288xf32>
    tpu.vector_store %arg7[%c64_190, %c288_191], %154 {strides = array<i32>} : memref<72x576xf32, #tpu.memory_space<vmem>>, vector<4x288xf32>,
    %c0_192 = arith.constant 0 : index
    %c0_193 = arith.constant 0 : index
    %156 = vector.load %arg3[%c0_192, %c0_193] : memref<4x72xbf16, #tpu.memory_space<vmem>>, vector<4x72xbf16>
    %c0_194 = arith.constant 0 : index
    %c0_195 = arith.constant 0 : index
    %157 = vector.load %arg7[%c0_194, %c0_195] : memref<72x576xf32, #tpu.memory_space<vmem>>, vector<72x576xf32>
    %158 = arith.truncf %157 : vector<72x576xf32> to vector<72x576xbf16>
    %cst_196 = arith.constant dense<0.000000e+00> : vector<4x576xf32>
    %159 = tpu.matmul %156, %158, %cst_196 {dimension_numbers = #tpu.dot_dimension_numbers<[1], [0], [0], [1], [0, 0, 1, 1], [], []>} : vector<4x72xbf16>, vector<72x576xbf16>, vector<4x576xf32> -> vector<4x576xf32>
    %c0_197 = arith.constant 0 : index
    %c2_198 = arith.constant 2 : index
    %160 = vector.load %arg5[%c0_197, %c2_198] : memref<4x4xf32, #tpu.memory_space<vmem>>, vector<4x1xf32>
    %c0_199 = arith.constant 0 : index
    %c3 = arith.constant 3 : index
    %161 = vector.load %arg5[%c0_199, %c3] : memref<4x4xf32, #tpu.memory_space<vmem>>, vector<4x1xf32>
    %162 = vector.broadcast %0 : vector<1x576xf32> to vector<4x576xf32>
    %163 = arith.mulf %159, %162 : vector<4x576xf32>
    %cst_200 = arith.constant dense<0.000000e+00> : vector<4xf32>
    %164 = vector.multi_reduction <add>, %163, %cst_200 [1] : vector<4x576xf32> to vector<4xf32>
    %165 = vector.shape_cast %164 : vector<4xf32> to vector<4x1xf32>
    %166 = arith.mulf %163, %163 : vector<4x576xf32>
    %cst_201 = arith.constant dense<0.000000e+00> : vector<4xf32>
    %167 = vector.multi_reduction <add>, %166, %cst_201 [1] : vector<4x576xf32> to vector<4xf32>
    %168 = vector.shape_cast %167 : vector<4xf32> to vector<4x1xf32>
    %cst_202 = arith.constant 5.120000e+02 : f32
    %169 = vector.broadcast %cst_202 : f32 to vector<4x1xf32>
    %170 = arith.divf %165, %169 : vector<4x1xf32>
    %cst_203 = arith.constant 5.120000e+02 : f32
    %171 = vector.broadcast %cst_203 : f32 to vector<4x1xf32>
    %172 = arith.divf %168, %171 : vector<4x1xf32>
    %173 = arith.mulf %170, %170 : vector<4x1xf32>
    %174 = arith.subf %172, %173 : vector<4x1xf32>
    %cst_204 = arith.constant 0.000000e+00 : f32
    %175 = vector.broadcast %cst_204 : f32 to vector<4x1xf32>
    %176 = arith.maximumf %174, %175 : vector<4x1xf32>
    %cst_205 = arith.constant 9.99999974E-6 : f32
    %177 = vector.broadcast %cst_205 : f32 to vector<4x1xf32>
    %178 = arith.addf %176, %177 : vector<4x1xf32>
    %179 = math.rsqrt %178 : vector<4x1xf32>
    %180 = arith.mulf %160, %179 : vector<4x1xf32>
    %181 = arith.mulf %170, %180 : vector<4x1xf32>
    %182 = arith.subf %161, %181 : vector<4x1xf32>
    %183 = vector.broadcast %180 : vector<4x1xf32> to vector<4x576xf32>
    %184 = arith.mulf %159, %183 : vector<4x576xf32>
    %185 = vector.broadcast %182 : vector<4x1xf32> to vector<4x576xf32>
    %186 = arith.addf %184, %185 : vector<4x576xf32>
    %187 = vector.broadcast %0 : vector<1x576xf32> to vector<4x576xf32>
    %188 = arith.mulf %186, %187 : vector<4x576xf32>
    %189 = vector.extract_strided_slice %188 {offsets = [0, 0], sizes = [4, 288], strides = [1, 1]} : vector<4x576xf32> to vector<4x288xf32>
    %c0_206 = arith.constant 0 : index
    %c0_207 = arith.constant 0 : index
    %c19_208 = arith.constant 19 : index
    %190 = vector.load %arg1[%c0_206, %c0_207, %c19_208] : memref<2x4x342xf32, #tpu.memory_space<vmem>>, vector<1x4x288xf32>
    %191 = vector.shape_cast %190 : vector<1x4x288xf32> to vector<4x288xf32>
    %192 = arith.addf %189, %191 : vector<4x288xf32>
    %c0_209 = arith.constant 0 : index
    %c0_210 = arith.constant 0 : index
    %c0_211 = arith.constant 0 : index
    %193 = vector.load %arg6[%c0_209, %c0_210, %c0_211] : memref<2x4x288xf32, #tpu.memory_space<vmem>>, vector<1x4x288xf32>
    %194 = vector.shape_cast %193 : vector<1x4x288xf32> to vector<4x288xf32>
    %195 = vector.shape_cast %192 : vector<4x288xf32> to vector<1x4x288xf32>
    tpu.vector_store %arg6[%c0_209, %c0_210, %c0_211], %195 {strides = array<i32>} : memref<2x4x288xf32, #tpu.memory_space<vmem>>, vector<1x4x288xf32>,
    %196 = vector.extract_strided_slice %188 {offsets = [0, 288], sizes = [4, 288], strides = [1, 1]} : vector<4x576xf32> to vector<4x288xf32>
    %c1_212 = arith.constant 1 : index
    %c0_213 = arith.constant 0 : index
    %c19_214 = arith.constant 19 : index
    %197 = vector.load %arg1[%c1_212, %c0_213, %c19_214] : memref<2x4x342xf32, #tpu.memory_space<vmem>>, vector<1x4x288xf32>
    %198 = vector.shape_cast %197 : vector<1x4x288xf32> to vector<4x288xf32>
    %199 = arith.addf %196, %198 : vector<4x288xf32>
    %c1_215 = arith.constant 1 : index
    %c0_216 = arith.constant 0 : index
    %c0_217 = arith.constant 0 : index
    %200 = vector.load %arg6[%c1_215, %c0_216, %c0_217] : memref<2x4x288xf32, #tpu.memory_space<vmem>>, vector<1x4x288xf32>
    %201 = vector.shape_cast %200 : vector<1x4x288xf32> to vector<4x288xf32>
    %202 = vector.shape_cast %199 : vector<4x288xf32> to vector<1x4x288xf32>
    tpu.vector_store %arg6[%c1_215, %c0_216, %c0_217], %202 {strides = array<i32>} : memref<2x4x288xf32, #tpu.memory_space<vmem>>, vector<1x4x288xf32>,
    return
  }
  func.func @transform_0(%arg0: i32) -> (i32, i32, i32) {
    %c0_i32 = arith.constant 0 : i32
    %c0_i32_0 = arith.constant 0 : i32
    %c0_i32_1 = arith.constant 0 : i32
    %c0_i32_2 = arith.constant 0 : i32
    return %c0_i32, %c0_i32_0, %c0_i32_1 : i32, i32, i32
  }
  func.func @transform_1(%arg0: i32) -> (i32, i32) {
    %c0_i32 = arith.constant 0 : i32
    %c0_i32_0 = arith.constant 0 : i32
    %c0_i32_1 = arith.constant 0 : i32
    return %c0_i32, %c0_i32_0 : i32, i32
  }
  func.func @transform_2(%arg0: i32) -> (i32, i32) {
    %c0_i32 = arith.constant 0 : i32
    %c0_i32_0 = arith.constant 0 : i32
    %c0_i32_1 = arith.constant 0 : i32
    return %c0_i32, %c0_i32_0 : i32, i32
  }
  func.func @transform_3(%arg0: i32) -> (i32, i32) {
    %c0_i32 = arith.constant 0 : i32
    %c0_i32_0 = arith.constant 0 : i32
    %c0_i32_1 = arith.constant 0 : i32
    return %c0_i32, %c0_i32_0 : i32, i32
  }
  func.func @transform_4(%arg0: i32) -> (i32, i32) {
    %c0_i32 = arith.constant 0 : i32
    %c0_i32_0 = arith.constant 0 : i32
    %c0_i32_1 = arith.constant 0 : i32
    return %c0_i32, %c0_i32_0 : i32, i32
  }
  func.func @transform_5(%arg0: i32) -> (i32, i32, i32) {
    %c0_i32 = arith.constant 0 : i32
    %c0_i32_0 = arith.constant 0 : i32
    %c0_i32_1 = arith.constant 0 : i32
    %c0_i32_2 = arith.constant 0 : i32
    return %c0_i32, %c0_i32_0, %c0_i32_1 : i32, i32, i32
  }
}

</mosaic_0001>

<bundles_post_ra>
// kernel: _lambda_.1
= control target key start
LH: loop header
LB: loop body
LE: loop exit
PB: predicated region body
PF: predicated region fallthrough
CT: control target
= control target key end

     0   :  { %v1573_v2 = vmov 0.0   ;;  %s1574_s22 = smov 127   ;;  %s1575_s23 = smov 126   ;;  %vm80_vm0 = vcmask 257024   ;;  %vm26_vm1 = vcmask 523264   ;;  %v1586_v16 = vmov 0   ;;  %s2217_s0 = inlined_call_operand.vmem [shape: f32[2,4,342], index: 0, kind: input, shape index: {}]   ;;  %s2218_s1 = inlined_call_operand.vmem [shape: bf16[4,72], index: 1, kind: input, shape index: {}]   ;;  %s2219_s3 = inlined_call_operand.vmem [shape: f32[1,576], index: 3, kind: input, shape index: {}]   ;;  %s2220_s4 = inlined_call_operand.vmem [shape: f32[4,4], index: 4, kind: input, shape index: {}]   ;;  %s2221_s2 = inlined_call_operand.vmem [shape: bf16[4,72], index: 2, kind: input, shape index: {}]   ;;  %s2222_s5 = inlined_call_operand.vmem [shape: f32[2,4,288], index: 5, kind: output, shape index: {}]  }
   0x1   :  { %v106_v0 = vld [vmem:[%s2217_s0 + $0x8] sm:$0xf]  ;;  %v1636_v1 = vld [vmem:[%s2217_s0] sm:$0xff]  ;;  %30 = vst [vmem:[#allocation2 + $0x38] sm:$0xff] %v1573_v2  ;;  %22 = vst [vmem:[#allocation2] sm:$0xff] %v1573_v2  ;;  %s1576_s26 = smov 110   ;;  %548 = vmatprep.mubr.bf16.mxu0 %v1586_v16  ;;  %589 = vmatprep.mubr.bf16.mxu1 %v1586_v16 }
   0x2   :  { %23 = vst [vmem:[#allocation2 + $0x8] sm:$0xff] %v1573_v2  ;;  %24 = vst [vmem:[#allocation2 + $0x10] sm:$0xff] %v1573_v2  ;;  %114 = vrot.lane.b32.xlu0 %v106_v0, %s1574_s22  ;;  %110 = vrot.lane.b32.xlu1 %v1636_v1, %s1574_s22  ;;  %v109_v3 = vcombine.high %v1636_v1, %v1636_v1  ;;  %v146_v4 = vld [vmem:[%s2217_s0 + $0x8] sm:$0xf]  ;;  %s1577_s29 = smov 109   ;;  %s1578_s7 = smov 108  }
   0x3   :  { %25 = vst [vmem:[#allocation2 + $0x18] sm:$0xff] %v1573_v2  ;;  %28 = vst [vmem:[#allocation2 + $0x28] sm:$0xff] %v1573_v2  ;;  %v186_v5 = vld [vmem:[%s2217_s0 + $0x8] sm:$0xf]  ;;  %s1579_s10 = smov 92   ;;  %s1580_s15 = smov 91   ;;  %1558 = vset.pattern.permute.xlu1 %v1586_v16 }
   0x4   :  { %29 = vst [vmem:[#allocation2 + $0x30] sm:$0xff] %v1573_v2  ;;  %31 = vst [vmem:[#allocation2 + $0x40] sm:$0xff] %v1573_v2  ;;  %v226_v6 = vld [vmem:[%s2217_s0 + $0x8] sm:$0xf]  ;;  %v1730_v11 = vld [vmem:[%s2217_s0 + $0xc] sm:$0xff]  ;;  %s1581_s20 = smov 32  }
   0x5   :  { %33 = vst [vmem:[#allocation2 + $0x50] sm:$0xff] %v1573_v2  ;;  %34 = vst [vmem:[#allocation2 + $0x58] sm:$0xff] %v1573_v2  ;;  %v266_v7 = vld [vmem:[%s2217_s0 + $0x8] sm:$0xf]  ;;  %v87_v12 = vcombine.high %v1730_v11, %v1730_v11  ;;  %s1582_s21 = smov 31   ;;  %s1583_s24 = smov 90  }
   0x6   :  { %35 = vst [vmem:[#allocation2 + $0x60] sm:$0xff] %v1573_v2  ;;  %36 = vst [vmem:[#allocation2 + $0x68] sm:$0xff] %v1573_v2  ;;  %152 = vrot.lane.b32.xlu1 %v109_v3, %s1575_s23  ;;  %112 = vrot.lane.b32.xlu0 %v109_v3, %s1574_s22  ;;  %v74_v8 = vld [vmem:[%s2217_s0 + $0x8] sm:$0xf]  ;;  %s1584_s28 = smov 30   ;;  %s1585_s30 = smov 14  }
   0x7   :  { %38 = vst [vmem:[#allocation2 + $0x78] sm:$0xff] %v1573_v2  ;;  %39 = vst [vmem:[#allocation2 + $0x80] sm:$0xff] %v1573_v2  ;;  %v306_v9 = vld [vmem:[%s2217_s0 + $0x8] sm:$0xf]  ;;  %v1462_v14 = vld [vmem:[%s2217_s0 + $0x14] sm:$0xf] }
   0x8   :  { %40 = vst [vmem:[#allocation2 + $0x88] sm:$0xff] %v1573_v2  ;;  %41 = vst [vmem:[#allocation2 + $0x90] sm:$0xff] %v1573_v2  ;;  %v346_v10 = vld [vmem:[%s2217_s0 + $0x8] sm:$0xf]  ;;  %v1460_v15 = vld [vmem:[%s2217_s0 + $0x14] sm:$0xf] }
   0x9   :  { %43 = vst [vmem:[#allocation2 + $0xa0] sm:$0xff] %v1573_v2  ;;  %44 = vst [vmem:[#allocation2 + $0xa8] sm:$0xff] %v1573_v2  ;;  %v386_v13 = vld [vmem:[%s2217_s0 + $0x8] sm:$0xf]  ;;  %s1587_s12 = smov 13   ;;  %s1588_s13 = smov 12  }
   0xa   :  { %45 = vst [vmem:[#allocation2 + $0xb0] sm:$0xff] %v1573_v2  ;;  %46 = vst [vmem:[#allocation2 + $0xb8] sm:$0xff] %v1573_v2  ;;  %192 = vrot.lane.b32.xlu1 %v109_v3, %s1576_s26  ;;  %154 = vrot.lane.b32.xlu0 %v146_v4, %s1575_s23  ;;  %v1466_v17 = vld [vmem:[%s2217_s0 + $0x14] sm:$0xf]  ;;  %s1589_s27 = smov 124   ;;  %s1590_s9 = smov 123  }
   0xb   :  { %48 = vst [vmem:[#allocation2 + $0xc8] sm:$0xff] %v1573_v2  ;;  %49 = vst [vmem:[#allocation2 + $0xd0] sm:$0xff] %v1573_v2  ;;  %v1464_v18 = vld [vmem:[%s2217_s0 + $0x14] sm:$0xf]  ;;  %s1591_s18 = smov 122   ;;  %vm116_vm2 = vcmask 1039360  }
   0xc   :  { %50 = vst [vmem:[#allocation2 + $0xd8] sm:$0xff] %v1573_v2  ;;  %51 = vst [vmem:[#allocation2 + $0xe0] sm:$0xff] %v1573_v2  ;;  %v1472_v19 = vld [vmem:[%s2217_s0 + $0x14] sm:$0xf]  ;;  %vm156_vm3 = vcmask 1031168   ;;  %vm196_vm4 = vcmask 900096  }
   0xd   :  { %53 = vst [vmem:[#allocation2 + $0xf0] sm:$0xff] %v1573_v2  ;;  %54 = vst [vmem:[#allocation2 + $0xf8] sm:$0xff] %v1573_v2  ;;  %v1474_v20 = vld [vmem:[%s2217_s0 + $0x14] sm:$0xf]  ;;  %vm236_vm5 = vcmask 891904   ;;  %vm276_vm6 = vcmask 883712  }
   0xe   :  { %55 = vst [vmem:[#allocation2 + $0x100] sm:$0xff] %v1573_v2  ;;  %56 = vst [vmem:[#allocation2 + $0x108] sm:$0xff] %v1573_v2  ;;  %150 = vrot.lane.b32.xlu1 %v1636_v1, %s1575_s23  ;;  %194 = vrot.lane.b32.xlu0 %v186_v5, %s1576_s26  ;;  %v1470_v21 = vld [vmem:[%s2217_s0 + $0x14] sm:$0xf]  ;;  %vm316_vm7 = vcmask 752640   ;;  %vm2224_vm8 = vcmask 744448  }
   0xf   :  { %58 = vst [vmem:[#allocation2 + $0x118] sm:$0xff] %v1573_v2  ;;  %59 = vst [vmem:[#allocation2 + $0x120] sm:$0xff] %v1573_v2  ;;  %v1468_v22 = vld [vmem:[%s2217_s0 + $0x14] sm:$0xf]  ;;  %vm100_vm9 = vcmask 1043712   ;;  %vm2226_vm10 = vcmask 261120  }
  0x10   :  { %60 = vst [vmem:[#allocation2 + $0x128] sm:$0xff] %v1573_v2  ;;  %61 = vst [vmem:[#allocation2 + $0x130] sm:$0xff] %v1573_v2  ;;  %v1476_v23 = vld [vmem:[%s2217_s0 + $0x14] sm:$0xf]  ;;  %vm2225_vm11 = vcmask 252928   ;;  %vm2223_vm12 = vcmask 736256  }
  0x11   :  { %63 = vst [vmem:[#allocation2 + $0x140] sm:$0xff] %v1573_v2  ;;  %64 = vst [vmem:[#allocation2 + $0x148] sm:$0xff] %v1573_v2  ;;  %vm2235_vm13 = vcmask 244736   ;;  %vm2228_vm14 = vcmask 113664   ;;  %vm500_vm15 = vcmask 1043456   ;;  %s1593_s16 = smov 1  }
  0x12   :  { %65 = vst [vmem:[#allocation2 + $0x150] sm:$0xff] %v1573_v2  ;;  %66 = vst [vmem:[#allocation2 + $0x158] sm:$0xff] %v1573_v2  ;;  %232 = vrot.lane.b32.xlu1 %v109_v3, %s1577_s29  ;;  %190 = vrot.lane.b32.xlu0 %v1636_v1, %s1576_s26  ;;  %s1595_s17 = smov 19   ;;  %s1596_s19 = smov 115  }
  0x13   :  { %68 = vst [vmem:[#allocation3] sm:$0xff] %v1573_v2  ;;  %71 = vst [vmem:[#allocation3 + $0xc] sm:$0xff] %v1573_v2 }
  0x14   :  { %78 = vst [vmem:[#allocation2] sm:$0xf] %v1636_v1  ;;  %79 = vst [vmem:[#allocation2 + $0x8] sm:$0xf] %v109_v3 }
  0x15   :  { %81 = vst.msk [vmem:[#allocation2 + $0x10] sm:$0xf] %vm80_vm0, %v74_v8 }
  0x16   :  { %272 = vrot.lane.b32.xlu1 %v109_v3, %s1578_s7  ;;  %234 = vrot.lane.b32.xlu0 %v226_v6, %s1577_s29  ;;  %32 = vst.msk [vmem:[#allocation2 + $0x48] sm:$0xff] %vm26_vm1, %v1573_v2  ;;  %27 = vst.msk [vmem:[#allocation2 + $0x20] sm:$0xff] %vm26_vm1, %v1573_v2 }
  0x17   :  { %37 = vst.msk [vmem:[#allocation2 + $0x70] sm:$0xff] %vm26_vm1, %v1573_v2  ;;  %42 = vst.msk [vmem:[#allocation2 + $0x98] sm:$0xff] %vm26_vm1, %v1573_v2 }
  0x18   :  { %47 = vst.msk [vmem:[#allocation2 + $0xc0] sm:$0xff] %vm26_vm1, %v1573_v2  ;;  %52 = vst.msk [vmem:[#allocation2 + $0xe8] sm:$0xff] %vm26_vm1, %v1573_v2 }
  0x19   :  { %57 = vst.msk [vmem:[#allocation2 + $0x110] sm:$0xff] %vm26_vm1, %v1573_v2  ;;  %62 = vst.msk [vmem:[#allocation2 + $0x138] sm:$0xff] %vm26_vm1, %v1573_v2 }
  0x1a   :  { %230 = vrot.lane.b32.xlu1 %v1636_v1, %s1577_s29  ;;  %274 = vrot.lane.b32.xlu0 %v266_v7, %s1578_s7  ;;  %67 = vst.msk [vmem:[#allocation2 + $0x160] sm:$0xff] %vm26_vm1, %v1573_v2  ;;  %vm103_vm1 = vcmask 519168  }
  0x1b   :  { %v427_v33 = vld [vmem:[#allocation2 + $0x8] sm:$0xff]  ;;  %v426_v34 = vld [vmem:[#allocation2] sm:$0xff] }
  0x1e   :  { %312 = vrot.lane.b32.xlu1 %v109_v3, %s1579_s10  ;;  %270 = vrot.lane.b32.xlu0 %v1636_v1, %s1578_s7 }
  0x22   :  { %352 = vrot.lane.b32.xlu1 %v109_v3, %s1580_s15  ;;  %314 = vrot.lane.b32.xlu0 %v306_v9, %s1579_s10 }
  0x26   :  { %310 = vrot.lane.b32.xlu1 %v1636_v1, %s1579_s10  ;;  %354 = vrot.lane.b32.xlu0 %v346_v10, %s1580_s15 }
  0x2a   :  { %350 = vrot.lane.b32.xlu0 %v1636_v1, %s1580_s15  ;;  %88 = vrot.lane.b32.xlu1 %v1730_v11, %s1581_s20 }
  0x2e   :  { %130 = vrot.lane.b32.xlu1 %v1730_v11, %s1582_s21  ;;  %90 = vrot.lane.b32.xlu0 %v87_v12, %s1581_s20 }
  0x32   :  { %390 = vrot.lane.b32.xlu1 %v1636_v1, %s1583_s24  ;;  %132 = vrot.lane.b32.xlu0 %v87_v12, %s1582_s21 }
  0x36   :  { %394 = vrot.lane.b32.xlu1 %v386_v13, %s1583_s24  ;;  %392 = vrot.lane.b32.xlu0 %v109_v3, %s1583_s24 }
  0x3a   :  { %172 = vrot.lane.b32.xlu1 %v87_v12, %s1584_s28  ;;  %170 = vrot.lane.b32.xlu0 %v1730_v11, %s1584_s28 }
  0x3e   :  { %212 = vrot.lane.b32.xlu1 %v87_v12, %s1585_s30  ;;  %210 = vrot.lane.b32.xlu0 %v1730_v11, %s1585_s30 }
  0x42   :  { %134 = vrot.lane.b32.xlu1 %v1462_v14, %s1582_s21  ;;  %92 = vrot.lane.b32.xlu0 %v1460_v15, %s1581_s20 }
  0x46   :  { %252 = vrot.lane.b32.xlu1 %v87_v12, %s1587_s12  ;;  %250 = vrot.lane.b32.xlu0 %v1730_v11, %s1587_s12 }
  0x4a   :  { %292 = vrot.lane.b32.xlu1 %v87_v12, %s1588_s13  ;;  %290 = vrot.lane.b32.xlu0 %v1730_v11, %s1588_s13 }
  0x4e   :  { %214 = vrot.lane.b32.xlu1 %v1466_v17, %s1585_s30  ;;  %174 = vrot.lane.b32.xlu0 %v1464_v18, %s1584_s28 }
  0x52   :  { %334 = vrot.lane.b32.xlu1 %v1472_v19, %s1589_s27  ;;  %332 = vrot.lane.b32.xlu0 %v87_v12, %s1589_s27 }
  0x56   :  { %374 = vrot.lane.b32.xlu1 %v1474_v20, %s1590_s9  ;;  %372 = vrot.lane.b32.xlu0 %v87_v12, %s1590_s9 }
  0x5a   :  { %294 = vrot.lane.b32.xlu1 %v1470_v21, %s1588_s13  ;;  %254 = vrot.lane.b32.xlu0 %v1468_v22, %s1587_s12 }
  0x5e   :  { %370 = vrot.lane.b32.xlu1 %v1730_v11, %s1590_s9  ;;  %330 = vrot.lane.b32.xlu0 %v1730_v11, %s1589_s27 }
  0x62   :  { %412 = vrot.lane.b32.xlu1 %v87_v12, %s1591_s18  ;;  %410 = vrot.lane.b32.xlu0 %v1730_v11, %s1591_s18 }
  0x66   :  { %414 = vrot.lane.b32.xlu0 %v1476_v23, %s1591_s18 }
  0x74   :  { %v115_v24 = vpop.permute.xlu0 %114  ;;  %v111_v25 = vpop.permute.xlu1 %110 }
  0x75   :  { %124 = vst.msk [vmem:[#allocation2 + $0x38] sm:$0xf] %vm80_vm0, %v115_v24 }
  0x78   :  { %v153_v26 = vpop.permute.xlu1 %152  ;;  %v113_v27 = vpop.permute.xlu0 %112 }
  0x79   :  { %v117_v28 = vsel %vm116_vm2, %v111_v25, %v113_v27  ;;  %v118_v29 = vsel %vm116_vm2, %v113_v27, %v115_v24 }
  0x7a   :  { %122 = vst [vmem:[#allocation2 + $0x28] sm:$0xf] %v117_v28  ;;  %123 = vst [vmem:[#allocation2 + $0x30] sm:$0xf] %v118_v29 }
  0x7c   :  { %v193_v30 = vpop.permute.xlu1 %192  ;;  %v155_v31 = vpop.permute.xlu0 %154 }
  0x7d   :  { %v158_v32 = vsel %vm156_vm3, %v153_v26, %v155_v31  ;;  %164 = vst.msk [vmem:[#allocation2 + $0x60] sm:$0xf] %vm80_vm0, %v155_v31 }
  0x7e   :  { %163 = vst [vmem:[#allocation2 + $0x58] sm:$0xf] %v158_v32 }
  0x80   :  { %v151_v35 = vpop.permute.xlu1 %150  ;;  %v195_v36 = vpop.permute.xlu0 %194 }
  0x81   :  { %v157_v37 = vsel %vm156_vm3, %v151_v35, %v153_v26  ;;  %v198_v38 = vsel %vm196_vm4, %v193_v30, %v195_v36  ;;  %204 = vst.msk [vmem:[#allocation2 + $0x88] sm:$0xf] %vm80_vm0, %v195_v36  ;;  %v432_v39 = vld [vmem:[#allocation2 + $0x30] sm:$0xff]  ;;  %v431_v40 = vld [vmem:[#allocation2 + $0x28] sm:$0xff] }
  0x82   :  { %162 = vst [vmem:[#allocation2 + $0x50] sm:$0xf] %v157_v37  ;;  %203 = vst [vmem:[#allocation2 + $0x80] sm:$0xf] %v198_v38  ;;  %v472_v41 = vpack.c.bf16 %v432_v39, %v427_v33  ;;  %v471_v42 = vpack.c.bf16 %v431_v40, %v426_v34 }
  0x84   :  { %v233_v43 = vpop.permute.xlu1 %232  ;;  %v191_v44 = vpop.permute.xlu0 %190  ;;  %516 = vmatprep.subr.bf16.mxu0 %v472_v41 }
  0x85   :  { %v197_v45 = vsel %vm196_vm4, %v191_v44, %v193_v30  ;;  %517 = vmatpush1.bf16.msra.mxu0 %v471_v42  ;;  %v437_v49 = vld [vmem:[#allocation2 + $0x58] sm:$0xff] }
  0x86   :  { %202 = vst [vmem:[#allocation2 + $0x78] sm:$0xf] %v197_v45 }
  0x88   :  { %v273_v46 = vpop.permute.xlu1 %272  ;;  %v235_v47 = vpop.permute.xlu0 %234 }
  0x89   :  { %v238_v48 = vsel %vm236_vm5, %v233_v43, %v235_v47  ;;  %244 = vst.msk [vmem:[#allocation2 + $0xb0] sm:$0xf] %vm80_vm0, %v235_v47  ;;  %v442_v50 = vld [vmem:[#allocation2 + $0x80] sm:$0xff]  ;;  %v436_v56 = vld [vmem:[#allocation2 + $0x50] sm:$0xff] }
  0x8a   :  { %243 = vst [vmem:[#allocation2 + $0xa8] sm:$0xf] %v238_v48  ;;  %v477_v51 = vpack.c.bf16 %v442_v50, %v437_v49 }
  0x8c   :  { %v231_v52 = vpop.permute.xlu1 %230  ;;  %v275_v53 = vpop.permute.xlu0 %274  ;;  %518 = vmatprep.subr.bf16.mxu0 %v477_v51 }
  0x8d   :  { %v237_v54 = vsel %vm236_vm5, %v231_v52, %v233_v43  ;;  %v278_v55 = vsel %vm276_vm6, %v273_v46, %v275_v53  ;;  %284 = vst.msk [vmem:[#allocation2 + $0xd8] sm:$0xf] %vm80_vm0, %v275_v53  ;;  %v441_v57 = vld [vmem:[#allocation2 + $0x78] sm:$0xff]  ;;  %v1860_v53 = vld [vmem:[%s2218_s1] sm:$0x3] }
  0x8e   :  { %242 = vst [vmem:[#allocation2 + $0xa0] sm:$0xf] %v237_v54  ;;  %283 = vst [vmem:[#allocation2 + $0xd0] sm:$0xf] %v278_v55  ;;  %v476_v58 = vpack.c.bf16 %v441_v57, %v436_v56 }
  0x90   :  { %v313_v59 = vpop.permute.xlu1 %312  ;;  %v271_v60 = vpop.permute.xlu0 %270  ;;  %519 = vmatpush1.bf16.msra.mxu0 %v476_v58 }
  0x91   :  { %v277_v61 = vsel %vm276_vm6, %v271_v60, %v273_v46  ;;  %v447_v1 = vld [vmem:[#allocation2 + $0xa8] sm:$0xff] }
  0x92   :  { %282 = vst [vmem:[#allocation2 + $0xc8] sm:$0xf] %v277_v61 }
  0x94   :  { %v353_v62 = vpop.permute.xlu1 %352  ;;  %v315_v63 = vpop.permute.xlu0 %314 }
  0x95   :  { %v318_v0 = vsel %vm316_vm7, %v313_v59, %v315_v63  ;;  %324 = vst.msk [vmem:[#allocation2 + $0x100] sm:$0xf] %vm80_vm0, %v315_v63  ;;  %v452_v3 = vld [vmem:[#allocation2 + $0xd0] sm:$0xff]  ;;  %v446_v9 = vld [vmem:[#allocation2 + $0xa0] sm:$0xff] }
  0x96   :  { %323 = vst [vmem:[#allocation2 + $0xf8] sm:$0xf] %v318_v0  ;;  %v482_v4 = vpack.c.bf16 %v452_v3, %v447_v1 }
  0x98   :  { %v311_v5 = vpop.permute.xlu1 %310  ;;  %v355_v6 = vpop.permute.xlu0 %354  ;;  %520 = vmatprep.subr.bf16.mxu0 %v482_v4 }
  0x99   :  { %v317_v7 = vsel %vm316_vm7, %v311_v5, %v313_v59  ;;  %v358_v8 = vsel %vm2224_vm8, %v353_v62, %v355_v6  ;;  %364 = vst.msk [vmem:[#allocation2 + $0x128] sm:$0xf] %vm80_vm0, %v355_v6  ;;  %v451_v10 = vld [vmem:[#allocation2 + $0xc8] sm:$0xff] }
  0x9a   :  { %322 = vst [vmem:[#allocation2 + $0xf0] sm:$0xf] %v317_v7  ;;  %363 = vst [vmem:[#allocation2 + $0x120] sm:$0xf] %v358_v8  ;;  %v481_v11 = vpack.c.bf16 %v451_v10, %v446_v9 }
  0x9c   :  { %v351_v12 = vpop.permute.xlu0 %350  ;;  %v89_v13 = vpop.permute.xlu1 %88  ;;  %521 = vmatpush1.bf16.msra.mxu0 %v481_v11 }
  0x9d   :  { %v357_v14 = vsel %vm2224_vm8, %v351_v12, %v353_v62  ;;  %101 = vst.msk [vmem:[#allocation2 + $0x10] sm:$0xf] %vm100_vm9, %v89_v13  ;;  %v457_v19 = vld [vmem:[#allocation2 + $0xf8] sm:$0xff]  ;;  %vm2234_vm8 = vcmask 105472  }
  0x9e   :  { %362 = vst [vmem:[#allocation2 + $0x118] sm:$0xf] %v357_v14 }
  0xa0   :  { %v131_v15 = vpop.permute.xlu1 %130  ;;  %v91_v17 = vpop.permute.xlu0 %90 }
  0xa1   :  { %142 = vst.msk [vmem:[#allocation2 + $0x38] sm:$0xf] %vm100_vm9, %v131_v15  ;;  %v95_v18 = vsel %vm2226_vm10, %v89_v13, %v91_v17  ;;  %v462_v20 = vld [vmem:[#allocation2 + $0x120] sm:$0xff]  ;;  %v456_v25 = vld [vmem:[#allocation2 + $0xf0] sm:$0xff] }
  0xa2   :  { %102 = vst [vmem:[#allocation2 + $0x18] sm:$0xf] %v95_v18  ;;  %v487_v21 = vpack.c.bf16 %v462_v20, %v457_v19 }
  0xa4   :  { %v391_v22 = vpop.permute.xlu1 %390  ;;  %v133_v23 = vpop.permute.xlu0 %132  ;;  %522 = vmatprep.subr.bf16.mxu0 %v487_v21  ;;  %v428_v34 = vld [vmem:[#allocation2 + $0x10] sm:$0xff] }
  0xa5   :  { %v137_v24 = vsel %vm2225_vm11, %v131_v15, %v133_v23  ;;  %v461_v26 = vld [vmem:[#allocation2 + $0x118] sm:$0xff] }
  0xa6   :  { %143 = vst [vmem:[#allocation2 + $0x40] sm:$0xf] %v137_v24  ;;  %v486_v27 = vpack.c.bf16 %v461_v26, %v456_v25 }
  0xa8   :  { %v395_v28 = vpop.permute.xlu1 %394  ;;  %v393_v29 = vpop.permute.xlu0 %392  ;;  %523 = vmatpush1.bf16.msra.mxu0 %v486_v27  ;;  %v433_v35 = vld [vmem:[#allocation2 + $0x38] sm:$0xff] }
  0xa9   :  { %404 = vst.msk [vmem:[#allocation2 + $0x150] sm:$0xf] %vm80_vm0, %v395_v28  ;;  %v397_v30 = vsel %vm2223_vm12, %v391_v22, %v393_v29  ;;  %v398_v31 = vsel %vm2223_vm12, %v393_v29, %v395_v28  ;;  %v429_v37 = vld [vmem:[#allocation2 + $0x18] sm:$0xff]  ;;  %v473_v40 = vpack.c.bf16 %v433_v35, %v428_v34  ;;  %vm2230_vm12 = vcmask 588800  }
  0xaa   :  { %402 = vst [vmem:[#allocation2 + $0x140] sm:$0xf] %v397_v30  ;;  %403 = vst [vmem:[#allocation2 + $0x148] sm:$0xf] %v398_v31 }
  0xac   :  { %v1846_v32 = vpop.permute.xlu1 %172  ;;  %v171_v33 = vpop.permute.xlu0 %170 }
  0xad   :  { %v177_v36 = vsel %vm2235_vm13, %v171_v33, %v1846_v32  ;;  %182 = vst.msk [vmem:[#allocation2 + $0x60] sm:$0xf] %vm100_vm9, %v171_v33  ;;  %v434_v38 = vld [vmem:[#allocation2 + $0x40] sm:$0xff] }
  0xae   :  { %183 = vst [vmem:[#allocation2 + $0x68] sm:$0xf] %v177_v36  ;;  %v474_v39 = vpack.c.bf16 %v434_v38, %v429_v37 }
  0xb0   :  { %v213_v41 = vpop.permute.xlu1 %212  ;;  %557 = vmatprep.subr.bf16.mxu1 %v474_v39  ;;  %v211_v42 = vpop.permute.xlu0 %210 }
  0xb1   :  { %v217_v43 = vsel %vm2228_vm14, %v211_v42, %v213_v41  ;;  %222 = vst.msk [vmem:[#allocation2 + $0x88] sm:$0xf] %vm100_vm9, %v211_v42  ;;  %558 = vmatpush1.bf16.msra.mxu1 %v473_v40  ;;  %v467_v44 = vld [vmem:[#allocation2 + $0x148] sm:$0xff]  ;;  %v466_v45 = vld [vmem:[#allocation2 + $0x140] sm:$0xff] }
  0xb2   :  { %223 = vst [vmem:[#allocation2 + $0x90] sm:$0xf] %v217_v43  ;;  %v492_v46 = vpack.c.bf16 %v467_v44, %v467_v44  ;;  %v491_v47 = vpack.c.bf16 %v466_v45, %v466_v45 }
  0xb4   :  { %v135_v48 = vpop.permute.xlu1 %134  ;;  %v93_v49 = vpop.permute.xlu0 %92  ;;  %1477 = vmatprep.subr.msk.bf16.mxu0 %vm500_vm15, %v492_v46  ;;  %v502_v50 = vsel %vm500_vm15, %v491_v47, 0  ;;  %v438_v61 = vld [vmem:[#allocation2 + $0x60] sm:$0xff] }
  0xb5   :  { %v138_v51 = vsel %vm2225_vm11, %v133_v23, %v135_v48  ;;  %v96_v52 = vsel %vm2226_vm10, %v91_v17, %v93_v49  ;;  %525 = vmatpush1.bf16.msra.mxu0 %v502_v50  ;;  %v439_v58 = vld [vmem:[#allocation2 + $0x68] sm:$0xff]  ;;  %vm2227_vm11 = vmmov 0   ;;  %vm2229_vm10 = vcmask 97280  }
  0xb6   :  { %144 = vst.msk [vmem:[#allocation2 + $0x48] sm:$0xf] %vm103_vm1, %v138_v51  ;;  %104 = vst.msk [vmem:[#allocation2 + $0x20] sm:$0xf] %vm103_vm1, %v96_v52  ;;  %1503 = vmatprep.subr.bf16.mxu0 %v1573_v2 }
  0xb8   :  { %v253_v54 = vpop.permute.xlu1 %252  ;;  %v251_v55 = vpop.permute.xlu0 %250  ;;  %v443_v56 = vld [vmem:[#allocation2 + $0x88] sm:$0xff]  ;;  %1478 = vmatmul.mubr.msk.bf16.vlgmr.msra.gmra.mrb[0].mxu0 %vm2230_vm12, %v1860_v53 }
  0xb9   :  { %v257_v57 = vsel %vm2234_vm8, %v251_v55, %v253_v54  ;;  %262 = vst.msk [vmem:[#allocation2 + $0xb0] sm:$0xf] %vm100_vm9, %v251_v55  ;;  %v444_v59 = vld [vmem:[#allocation2 + $0x90] sm:$0xff]  ;;  %1513 = vmatprep.mubr.msk.bf16.mxu0 %vm2227_vm11, %v1573_v2  ;;  %v478_v62 = vpack.c.bf16 %v443_v56, %v438_v61  ;;  %vm2233_vm11 = vcmask 1014784  }
  0xba   :  { %263 = vst [vmem:[#allocation2 + $0xb8] sm:$0xf] %v257_v57  ;;  %v479_v60 = vpack.c.bf16 %v444_v59, %v439_v58 }
  0xbc   :  { %v293_v63 = vpop.permute.xlu1 %292  ;;  %v291_v0 = vpop.permute.xlu0 %290  ;;  %559 = vmatprep.subr.bf16.mxu1 %v479_v60  ;;  %v640_v60 = vlaneseq }
  0xbd   :  { %v297_v1 = vsel %vm2229_vm10, %v291_v0, %v293_v63  ;;  %302 = vst.msk [vmem:[#allocation2 + $0xd8] sm:$0xf] %vm100_vm9, %v291_v0  ;;  %560 = vmatpush1.bf16.msra.mxu1 %v478_v62  ;;  %v430_v3 = vld [vmem:[#allocation2 + $0x20] sm:$0xff]  ;;  %v435_v4 = vld [vmem:[#allocation2 + $0x48] sm:$0xff] }
  0xbe   :  { %303 = vst [vmem:[#allocation2 + $0xe0] sm:$0xf] %v297_v1  ;;  %v475_v5 = vpack.c.bf16 %v435_v4, %v430_v3  ;;  %v641_v61 = vshrl.u32 %v640_v60, 7 }
  0xc0   :  { %v215_v6 = vpop.permute.xlu1 %214  ;;  %v175_v7 = vpop.permute.xlu0 %174  ;;  %1504 = vmatpush3.bf16.msra.mxu0 %v475_v5  ;;  %v448_v18 = vld [vmem:[#allocation2 + $0xb0] sm:$0xff]  ;;  %v642_v62 = vsub.s32 0, %v641_v61  ;;  %v646_v0 = vsub.s32 1, %v641_v61 }
  0xc1   :  { %v218_v8 = vsel %vm2228_vm14, %v213_v41, %v215_v6  ;;  %v178_v9 = vsel %vm2235_vm13, %v1846_v32, %v175_v7  ;;  %1505 = vmatprep.subr.bf16.mxu0 %v1573_v2  ;;  %v449_v14 = vld [vmem:[#allocation2 + $0xb8] sm:$0xff]  ;;  %vm2231_vm14 = vcmask 1006592   ;;  %vm772_vm13 = vcmask 941056  }
  0xc2   :  { %224 = vst.msk [vmem:[#allocation2 + $0x98] sm:$0xf] %vm103_vm1, %v218_v8  ;;  %184 = vst.msk [vmem:[#allocation2 + $0x70] sm:$0xf] %vm103_vm1, %v178_v9 }
  0xc4   :  { %v335_v10 = vpop.permute.xlu1 %334  ;;  %v333_v11 = vpop.permute.xlu0 %332  ;;  %v453_v12 = vld [vmem:[#allocation2 + $0xd8] sm:$0xff] }
  0xc5   :  { %344 = vst.msk [vmem:[#allocation2 + $0x110] sm:$0xf] %vm103_vm1, %v335_v10  ;;  %v338_v13 = vsel %vm2233_vm11, %v333_v11, %v335_v10  ;;  %v454_v15 = vld [vmem:[#allocation2 + $0xe0] sm:$0xff]  ;;  %v483_v19 = vpack.c.bf16 %v453_v12, %v448_v18  ;;  %v650_v18 = vsub.s32 2, %v641_v61 }
  0xc6   :  { %343 = vst [vmem:[#allocation2 + $0x108] sm:$0xf] %v338_v13  ;;  %v484_v17 = vpack.c.bf16 %v454_v15, %v449_v14 }
  0xc8   :  { %v375_v20 = vpop.permute.xlu1 %374  ;;  %v373_v21 = vpop.permute.xlu0 %372  ;;  %561 = vmatprep.subr.bf16.mxu1 %v484_v17  ;;  %v658_v17 = vsub.s32 4, %v641_v61 }
  0xc9   :  { %384 = vst.msk [vmem:[#allocation2 + $0x138] sm:$0xf] %vm103_vm1, %v375_v20  ;;  %v378_v22 = vsel %vm2231_vm14, %v373_v21, %v375_v20  ;;  %562 = vmatpush1.bf16.msra.mxu1 %v483_v19  ;;  %v440_v23 = vld [vmem:[#allocation2 + $0x70] sm:$0xff]  ;;  %v445_v24 = vld [vmem:[#allocation2 + $0x98] sm:$0xff]  ;;  %v654_v19 = vsub.s32 3, %v641_v61 }
  0xca   :  { %383 = vst [vmem:[#allocation2 + $0x130] sm:$0xf] %v378_v22  ;;  %v480_v25 = vpack.c.bf16 %v445_v24, %v440_v23 }
  0xcc   :  { %v295_v26 = vpop.permute.xlu1 %294  ;;  %v255_v27 = vpop.permute.xlu0 %254  ;;  %1506 = vmatpush3.bf16.msra.mxu0 %v480_v25  ;;  %v460_v43 = vld [vmem:[#allocation2 + $0x110] sm:$0xff] }
  0xcd   :  { %v298_v28 = vsel %vm2229_vm10, %v293_v63, %v295_v26  ;;  %v258_v29 = vsel %vm2234_vm8, %v253_v54, %v255_v27  ;;  %1507 = vmatprep.subr.bf16.mxu0 %v1573_v2  ;;  %v459_v34 = vld [vmem:[#allocation2 + $0x108] sm:$0xff]  ;;  %vm2232_vm10 = vcmask 998400   ;;  %v21_v63 = vld [vmem:[%s2219_s3] sm:$0x1f] }
  0xce   :  { %304 = vst.msk [vmem:[#allocation2 + $0xe8] sm:$0xf] %vm103_vm1, %v298_v28  ;;  %264 = vst.msk [vmem:[#allocation2 + $0xc0] sm:$0xf] %vm103_vm1, %v258_v29  ;;  %v1910_v1 = vrot.slane %v21_v63, %v642_v62  ;;  %v1912_v3 = vrot.slane %v21_v63, %v646_v0  ;;  %v1926_v20 = vrot.slane %v21_v63, %v658_v17  ;;  %v1594_v62 = vmov 1  }
  0xcf   :  { %v1930_v22 = vrot.slane %v21_v63, %v654_v19 }
  0xd0   :  { %v371_v30 = vpop.permute.xlu1 %370  ;;  %v331_v31 = vpop.permute.xlu0 %330  ;;  %v465_v44 = vld [vmem:[#allocation2 + $0x138] sm:$0xff] }
  0xd1   :  { %v377_v32 = vsel %vm2231_vm14, %v371_v30, %v373_v21  ;;  %v337_v33 = vsel %vm2233_vm11, %v331_v31, %v333_v11  ;;  %v464_v35 = vld [vmem:[#allocation2 + $0x130] sm:$0xff]  ;;  %v490_v50 = vpack.c.bf16 %v465_v44, %v460_v43  ;;  %v1928_v21 = vrot.slane %v21_v63, %v650_v18 }
  0xd2   :  { %382 = vst.msk [vmem:[#allocation2 + $0x128] sm:$0xf] %vm100_vm9, %v377_v32  ;;  %342 = vst.msk [vmem:[#allocation2 + $0x100] sm:$0xf] %vm100_vm9, %v337_v33  ;;  %v489_v36 = vpack.c.bf16 %v464_v35, %v459_v34  ;;  %vm757_vm14 = vcmask 1047556   ;;  %vm760_vm11 = vcmask 412672  }
  0xd4   :  { %v413_v37 = vpop.permute.xlu1 %412  ;;  %v411_v38 = vpop.permute.xlu0 %410  ;;  %563 = vmatprep.subr.bf16.mxu1 %v489_v36 }
  0xd5   :  { %v417_v39 = vsel %vm2232_vm10, %v411_v38, %v413_v37  ;;  %v450_v40 = vld [vmem:[#allocation2 + $0xc0] sm:$0xff]  ;;  %v455_v41 = vld [vmem:[#allocation2 + $0xe8] sm:$0xff] }
  0xd6   :  { %422 = vst.msk [vmem:[#allocation2 + $0x150] sm:$0xf] %vm100_vm9, %v417_v39  ;;  %v485_v42 = vpack.c.bf16 %v455_v41, %v450_v40 }
  0xd8   :  { %v415_v45 = vpop.permute.xlu0 %414  ;;  %1508 = vmatpush3.bf16.msra.mxu0 %v485_v42 }
  0xd9   :  { %v418_v46 = vsel %vm2232_vm10, %v413_v37, %v415_v45  ;;  %424 = vst.msk [vmem:[#allocation2 + $0x160] sm:$0xf] %vm103_vm1, %v415_v45  ;;  %1509 = vmatprep.subr.bf16.mxu0 %v1573_v2  ;;  %v458_v47 = vld [vmem:[#allocation2 + $0x100] sm:$0xff]  ;;  %v463_v48 = vld [vmem:[#allocation2 + $0x128] sm:$0xff]  ;;  %vm751_vm10 = vcmask 154624  }
  0xda   :  { %423 = vst [vmem:[#allocation2 + $0x158] sm:$0xf] %v418_v46  ;;  %v488_v49 = vpack.c.bf16 %v463_v48, %v458_v47 }
  0xdc   :  { %564 = vmatpush1.bf16.msra.mxu1 %v488_v49  ;;  %1510 = vmatpush3.bf16.msra.mxu0 %v490_v50 }
  0xdd   :  { %1511 = vmatprep.subr.bf16.mxu0 %v1573_v2  ;;  %v468_v51 = vld [vmem:[#allocation2 + $0x150] sm:$0xff] }
  0xde   :  { %v493_v54 = vpack.c.bf16 %v468_v51, %v468_v51 }
  0xe0   :  { %v470_v52 = vld [vmem:[#allocation2 + $0x160] sm:$0xff]  ;;  %v508_v59 = vsel %vm500_vm15, %v493_v54, 0 }
  0xe1   :  { %v469_v55 = vld [vmem:[#allocation2 + $0x158] sm:$0xff]  ;;  %v495_v56 = vpack.c.bf16 %v470_v52, %v470_v52 }
  0xe2   :  { %v494_v57 = vpack.c.bf16 %v469_v55, %v469_v55 }
  0xe3   :  { %v514_v58 = vsel %vm500_vm15, %v495_v56, 0 }
  0xe4   :  { %1479 = vmatprep.subr.msk.bf16.mxu1 %vm500_vm15, %v494_v57  ;;  %1512 = vmatpush3.bf16.msra.mxu0 %v514_v58  ;;  %v638_v58 = vld [vmem:[%s2220_s4] sm:$0xf] }
  0xe5   :  { %566 = vmatpush1.bf16.msra.mxu1 %v508_v59 }
  0xe7   :  { %1514 = vmatmul.mubr.msk.bf16.vlgmr.msra.gmra.mrb[4].mxu0 %vm2230_vm12, %v1860_v53 }
  0xe8   :  { %1480 = vmatmul.mubr.msk.bf16.vlgmr.msra.gmra.mrb[0].mxu1 %vm2230_vm12, %v1860_v53  ;;  %1272 = vmatprep.mubr.bf16.mxu0 %v1586_v16  ;;  %vm69_vm12 = vcmask 699392  }
  0xe9   :  { %1231 = vmatprep.mubr.bf16.mxu1 %v1586_v16  ;;  %70 = vst.msk [vmem:[#allocation3 + $0x8] sm:$0xf] %vm69_vm12, %v1573_v2  ;;  %72 = vst.msk [vmem:[#allocation3 + $0x14] sm:$0xf] %vm69_vm12, %v1573_v2  ;;  %vm756_vm12 = vcmask 1043608  }
  0xea   :  { %vm758_vm8 = vmor %vm757_vm14, %vm756_vm12  ;;  %vm2246_vm12 = vcmask 105472  }
 0x18b   :  { %v1914_v4 = vpop.f32.mrb[0].mxu0 }
 0x18c   :  { %v665_v53 = vmul.f32 %v1910_v1, %v1914_v4  ;;  %v1918_v5 = vpop.f32.mrb[1].mxu0 }
 0x18d   :  { %v666_v16 = vmul.f32 %v1912_v3, %v1918_v5  ;;  %v554_v6 = vpop.f32.mrb[2].mxu0 }
 0x18e   :  { %v670_v7 = vsel %vm500_vm15, %v665_v53, 0.0  ;;  %v681_v8 = vmul.f32 %v665_v53, %v665_v53  ;;  %v555_v9 = vpop.f32.mrb[3].mxu0 }
 0x18f   :  { %v671_v10 = vsel %vm500_vm15, %v666_v16, 0.0  ;;  %v682_v11 = vmul.f32 %v666_v16, %v666_v16 }
 0x190   :  { %v686_v12 = vsel %vm500_vm15, %v681_v8, 0.0  ;;  %v672_v13 = vadd.f32 %v671_v10, %v670_v7 }
 0x191   :  { %v687_v14 = vsel %vm500_vm15, %v682_v11, 0.0 }
 0x192   :  { %v688_v15 = vadd.f32 %v687_v14, %v686_v12 }
 0x1ba   :  { %v632_v23 = vpop.f32.mrb[4].mxu0 }
 0x1bb   :  { %v591_v24 = vpop.f32.mrb[0].mxu1  ;;  %v669_v25 = vmul.f32 %v1926_v20, %v632_v23  ;;  %v1515_v26 = vpop.f32.mrb[5].mxu0 }
 0x1bc   :  { %v667_v27 = vmul.f32 %v1928_v21, %v591_v24  ;;  %v593_v28 = vpop.f32.mrb[1].mxu1  ;;  %v635_v29 = vpop.f32.mrb[6].mxu0 }
 0x1bd   :  { %v668_v30 = vmul.f32 %v1930_v22, %v593_v28  ;;  %v595_v31 = vpop.f32.mrb[2].mxu1  ;;  %v1516_v32 = vpop.f32.mrb[7].mxu0  ;;  %v685_v35 = vmul.f32 %v669_v25, %v669_v25  ;;  %v677_v41 = vsel %vm103_vm1, %v669_v25, 0.0 }
 0x1be   :  { %v673_v33 = vsel %vm500_vm15, %v667_v27, 0.0  ;;  %v683_v34 = vmul.f32 %v667_v27, %v667_v27  ;;  %v596_v36 = vpop.f32.mrb[3].mxu1 }
 0x1bf   :  { %v674_v37 = vadd.f32 %v673_v33, %v672_v13  ;;  %v675_v38 = vsel %vm500_vm15, %v668_v30, 0.0  ;;  %v684_v39 = vmul.f32 %v668_v30, %v668_v30  ;;  %v693_v45 = vsel %vm103_vm1, %v685_v35, 0.0 }
 0x1c0   :  { %v689_v40 = vsel %vm500_vm15, %v683_v34, 0.0 }
 0x1c1   :  { %v676_v42 = vadd.f32 %v675_v38, %v674_v37  ;;  %v690_v43 = vadd.f32 %v689_v40, %v688_v15  ;;  %v691_v44 = vsel %vm500_vm15, %v684_v39, 0.0 }
 0x1c3   :  { %v678_v46 = vadd.f32 %v677_v41, %v676_v42  ;;  %v692_v47 = vadd.f32 %v691_v44, %v690_v43 }
 0x1c5   :  { %679 = vadd.xlane.f32.xlu1 %v678_v46  ;;  %v694_v48 = vadd.f32 %v693_v45, %v692_v47 }
 0x1c7   :  { %695 = vadd.xlane.f32.xlu0 %v694_v48 }
 0x252   :  { %v680_v49 = vpop.xlane.xlu1 %679 }
 0x253   :  { %v698_v50 = vmul.f32 0.001953125, %v680_v49 }
 0x254   :  { %v696_v51 = vpop.xlane.xlu0 %695 }
 0x255   :  { %v700_v52 = vmul.f32 %v698_v50, %v698_v50  ;;  %v699_v54 = vmul.f32 0.001953125, %v696_v51 }
 0x257   :  { %v701_v55 = vsub.f32 %v699_v54, %v700_v52 }
 0x259   :  { %v702_v56 = vmax.f32 %v701_v55, 0.0 }
 0x25b   :  { %v703_v57 = vadd.f32 1e-05, %v702_v56 }
 0x25d   :  { %1569 = vrsqrt.f32 %v703_v57 }
 0x267   :  { %v1570_v59 = vpop.eup %1569 }
 0x268   :  { %v705_v60 = vmul.f32 %v1570_v59, %v638_v58 }
 0x26a   :  { %714 = vperm.xlu1 %1558, %v705_v60   ;;  %v706_v61 = vmul.f32 %v705_v60, %v698_v50 }
 0x26c   :  { %708 = vrot.lane.b32.xlu0 %v706_v61, %s1593_s16 }
 0x26e   :  { %1559 = vset.pattern.permute.xlu1 %v1594_v62 }
 0x2de   :  { %v709_v63 = vpop.permute.xlu0 %708 }
 0x2df   :  { %v711_v0 = vsub.f32 %v638_v58, %v709_v63 }
 0x2e1   :  { %724 = vperm.xlu1 %1559, %v711_v0  }
 0x2e9   :  { %v715_v53 = vpop.permute.xlu1 %714 }
 0x2ea   :  { %v717_v16 = vmul.f32 %v715_v53, %v1914_v4  ;;  %v718_v6 = vmul.f32 %v715_v53, %v1918_v5  ;;  %v719_v7 = vmul.f32 %v715_v53, %v591_v24  ;;  %v721_v8 = vmul.f32 %v715_v53, %v632_v23 }
 0x2eb   :  { %v720_v9 = vmul.f32 %v715_v53, %v593_v28 }
 0x360   :  { %v725_v10 = vpop.permute.xlu1 %724 }
 0x361   :  { %v729_v11 = vadd.f32 %v725_v10, %v719_v7  ;;  %v727_v12 = vadd.f32 %v725_v10, %v717_v16  ;;  %v728_v13 = vadd.f32 %v725_v10, %v718_v6  ;;  %v731_v14 = vadd.f32 %v725_v10, %v721_v8 }
 0x362   :  { %v730_v15 = vadd.f32 %v725_v10, %v720_v9 }
 0x363   :  { %v734_v17 = vmax.f32 %v729_v11, 0.0  ;;  %v732_v18 = vmax.f32 %v727_v12, 0.0  ;;  %v733_v19 = vmax.f32 %v728_v13, 0.0  ;;  %v736_v5 = vmax.f32 %v731_v14, 0.0 }
 0x364   :  { %v735_v25 = vmax.f32 %v730_v15, 0.0 }
 0x365   :  { %v739_v26 = vmul.f32 %v734_v17, %v1928_v21  ;;  %v737_v27 = vmul.f32 %v732_v18, %v1910_v1  ;;  %v738_v4 = vmul.f32 %v733_v19, %v1912_v3  ;;  %v741_v29 = vmul.f32 %v736_v5, %v1926_v20 }
 0x366   :  { %v740_v23 = vmul.f32 %v735_v25, %v1930_v22 }
 0x367   :  { %748 = vrot.lane.b32.xlu1 %v739_v26, %s1595_s17  ;;  %v745_v24 = vcombine.low %v737_v27, %v738_v4 }
 0x368   :  { %v764_v28 = vcombine.low %v739_v26, %v740_v23 }
 0x369   :  { %746 = vrot.lane.b32.xlu0 %v745_v24, %s1595_s17 }
 0x36b   :  { %767 = vrot.lane.b32.xlu1 %v741_v29, %s1596_s19 }
 0x36d   :  { %765 = vrot.lane.b32.xlu0 %v764_v28, %s1596_s19 }
 0x3d9   :  { %v749_v30 = vpop.permute.xlu1 %748 }
 0x3db   :  { %v747_v31 = vpop.permute.xlu0 %746 }
 0x3dc   :  { %v750_v32 = vrot.slane %v747_v31, 4 }
 0x3dd   :  { %v768_v33 = vpop.permute.xlu1 %767 }
 0x3de   :  { %v752_v34 = vsel %vm751_vm10, %v750_v32, %v747_v31  ;;  %v753_v35 = vsel %vm751_vm10, %v750_v32, %v749_v30  ;;  %778 = vst.msk [vmem:[#allocation3 + $0x14] sm:$0xf] %vm760_vm11, %v768_v33  ;;  %v770_v37 = vrot.slane %v768_v33, 4  ;;  %vm2242_vm10 = vcmask 113664  }
 0x3df   :  { %759 = vst.msk [vmem:[#allocation3] sm:$0xff] %vm758_vm8, %v752_v34  ;;  %v766_v36 = vpop.permute.xlu0 %765 }
 0x3e0   :  { %761 = vst.msk [vmem:[#allocation3 + $0x8] sm:$0xf] %vm760_vm11, %v753_v35  ;;  %v769_v38 = vrot.slane %v766_v36, 4  ;;  %vm2243_vm11 = vmmov %vm2242_vm10 }
 0x3e2   :  { %v771_v39 = vsel %vm500_vm15, %v769_v38, %v770_v37 }
 0x3e3   :  { %v773_v40 = vsel %vm772_vm13, %v766_v36, %v771_v39  ;;  %vm2244_vm13 = vcmask 261120  }
 0x3e4   :  { %777 = vst.msk [vmem:[#allocation3 + $0xc] sm:$0xff] %vm758_vm8, %v773_v40  ;;  %vm2245_vm14 = vmmov %vm2244_vm13 }
 0x3e5   :  { %v826_v41 = vld [vmem:[#allocation3 + $0x14] sm:$0xf] }
 0x3e6   :  { %v788_v42 = vld [vmem:[#allocation3 + $0x14] sm:$0xf]  ;;  %v779_v43 = vld [vmem:[#allocation3] sm:$0xff]  ;;  %834 = vrot.lane.b32.xlu1 %v826_v41, %s1582_s21 }
 0x3e7   :  { %796 = vrot.lane.b32.xlu0 %v788_v42, %s1581_s20  ;;  %v782_v44 = vcombine.high %v779_v43, %v779_v43  ;;  %784 = vst [vmem:[#allocation2] sm:$0xf] %v779_v43  ;;  %v902_v45 = vld [vmem:[#allocation3 + $0x14] sm:$0xf]  ;;  %v780_v47 = vld [vmem:[#allocation3 + $0x8] sm:$0xf] }
 0x3e8   :  { %v864_v46 = vld [vmem:[#allocation3 + $0x14] sm:$0xf]  ;;  %786 = vst.msk [vmem:[#allocation2 + $0x10] sm:$0xf] %vm80_vm0, %v780_v47  ;;  %v845_v52 = vld [vmem:[#allocation3 + $0x8] sm:$0xf] }
 0x3e9   :  { %785 = vst [vmem:[#allocation2 + $0x8] sm:$0xf] %v782_v44  ;;  %v1016_v48 = vld [vmem:[#allocation3 + $0x14] sm:$0xf]  ;;  %v807_v54 = vld [vmem:[#allocation3 + $0x8] sm:$0xf] }
 0x3ea   :  { %910 = vrot.lane.b32.xlu1 %v902_v45, %s1585_s30  ;;  %v940_v49 = vld [vmem:[#allocation3 + $0x14] sm:$0xf]  ;;  %v883_v55 = vld [vmem:[#allocation3 + $0x8] sm:$0xf] }
 0x3eb   :  { %872 = vrot.lane.b32.xlu0 %v864_v46, %s1584_s28  ;;  %v1054_v50 = vld [vmem:[#allocation3 + $0x14] sm:$0xf]  ;;  %v921_v56 = vld [vmem:[#allocation3 + $0x8] sm:$0xf]  ;;  %v787_v61 = vld [vmem:[#allocation3 + $0xc] sm:$0xff] }
 0x3ec   :  { %v978_v51 = vld [vmem:[#allocation3 + $0x14] sm:$0xf]  ;;  %v959_v57 = vld [vmem:[#allocation3 + $0x8] sm:$0xf]  ;;  %v791_v62 = vcombine.high %v787_v61, %v787_v61 }
 0x3ed   :  { %v1073_v58 = vld [vmem:[#allocation3 + $0x8] sm:$0xf]  ;;  %v1092_v63 = vld [vmem:[#allocation3 + $0x14] sm:$0xf] }
 0x3ee   :  { %1024 = vrot.lane.b32.xlu1 %v1016_v48, %s1589_s27  ;;  %v997_v59 = vld [vmem:[#allocation3 + $0x8] sm:$0xf] }
 0x3ef   :  { %948 = vrot.lane.b32.xlu0 %v940_v49, %s1587_s12  ;;  %v1035_v60 = vld [vmem:[#allocation3 + $0x8] sm:$0xf] }
 0x3f2   :  { %1062 = vrot.lane.b32.xlu1 %v1054_v50, %s1590_s9 }
 0x3f3   :  { %811 = vrot.lane.b32.xlu0 %v779_v43, %s1574_s22 }
 0x3f6   :  { %986 = vrot.lane.b32.xlu1 %v978_v51, %s1588_s13 }
 0x3f7   :  { %853 = vrot.lane.b32.xlu0 %v845_v52, %s1575_s23 }
 0x3fa   :  { %815 = vrot.lane.b32.xlu1 %v807_v54, %s1574_s22 }
 0x3fb   :  { %891 = vrot.lane.b32.xlu0 %v883_v55, %s1576_s26 }
 0x3fe   :  { %849 = vrot.lane.b32.xlu1 %v779_v43, %s1575_s23 }
 0x3ff   :  { %887 = vrot.lane.b32.xlu0 %v779_v43, %s1576_s26 }
 0x402   :  { %925 = vrot.lane.b32.xlu1 %v779_v43, %s1577_s29 }
 0x403   :  { %929 = vrot.lane.b32.xlu0 %v921_v56, %s1577_s29 }
 0x406   :  { %1001 = vrot.lane.b32.xlu1 %v779_v43, %s1579_s10 }
 0x407   :  { %967 = vrot.lane.b32.xlu0 %v959_v57, %s1578_s7 }
 0x40a   :  { %1077 = vrot.lane.b32.xlu1 %v779_v43, %s1583_s24 }
 0x40b   :  { %963 = vrot.lane.b32.xlu0 %v779_v43, %s1578_s7 }
 0x40e   :  { %1081 = vrot.lane.b32.xlu1 %v1073_v58, %s1583_s24 }
 0x40f   :  { %1005 = vrot.lane.b32.xlu0 %v997_v59, %s1579_s10 }
 0x412   :  { %792 = vrot.lane.b32.xlu1 %v787_v61, %s1581_s20 }
 0x413   :  { %1043 = vrot.lane.b32.xlu0 %v1035_v60, %s1580_s15  ;;  %v1112_v60 = vld [vmem:[#allocation2 + $0x8] sm:$0xff] }
 0x416   :  { %830 = vrot.lane.b32.xlu1 %v787_v61, %s1582_s21 }
 0x417   :  { %1039 = vrot.lane.b32.xlu0 %v779_v43, %s1580_s15 }
 0x41a   :  { %851 = vrot.lane.b32.xlu1 %v782_v44, %s1575_s23 }
 0x41b   :  { %868 = vrot.lane.b32.xlu0 %v787_v61, %s1584_s28 }
 0x41e   :  { %889 = vrot.lane.b32.xlu1 %v782_v44, %s1576_s26 }
 0x41f   :  { %906 = vrot.lane.b32.xlu0 %v787_v61, %s1585_s30 }
 0x422   :  { %927 = vrot.lane.b32.xlu1 %v782_v44, %s1577_s29 }
 0x423   :  { %944 = vrot.lane.b32.xlu0 %v787_v61, %s1587_s12 }
 0x426   :  { %965 = vrot.lane.b32.xlu1 %v782_v44, %s1578_s7 }
 0x427   :  { %982 = vrot.lane.b32.xlu0 %v787_v61, %s1588_s13 }
 0x42a   :  { %1003 = vrot.lane.b32.xlu1 %v782_v44, %s1579_s10 }
 0x42b   :  { %813 = vrot.lane.b32.xlu0 %v782_v44, %s1574_s22 }
 0x42e   :  { %1041 = vrot.lane.b32.xlu1 %v782_v44, %s1580_s15 }
 0x42f   :  { %1020 = vrot.lane.b32.xlu0 %v787_v61, %s1589_s27 }
 0x432   :  { %870 = vrot.lane.b32.xlu1 %v791_v62, %s1584_s28 }
 0x433   :  { %1079 = vrot.lane.b32.xlu0 %v782_v44, %s1583_s24 }
 0x436   :  { %908 = vrot.lane.b32.xlu1 %v791_v62, %s1585_s30 }
 0x437   :  { %794 = vrot.lane.b32.xlu0 %v791_v62, %s1581_s20 }
 0x43a   :  { %946 = vrot.lane.b32.xlu1 %v791_v62, %s1587_s12 }
 0x43b   :  { %832 = vrot.lane.b32.xlu0 %v791_v62, %s1582_s21 }
 0x43e   :  { %984 = vrot.lane.b32.xlu1 %v791_v62, %s1588_s13 }
 0x43f   :  { %1096 = vrot.lane.b32.xlu0 %v787_v61, %s1591_s18 }
 0x442   :  { %1058 = vrot.lane.b32.xlu1 %v787_v61, %s1590_s9  ;;  %v1111_v61 = vld [vmem:[#allocation2] sm:$0xff] }
 0x443   :  { %1022 = vrot.lane.b32.xlu0 %v791_v62, %s1589_s27 }
 0x446   :  { %1098 = vrot.lane.b32.xlu1 %v791_v62, %s1591_s18 }
 0x447   :  { %1060 = vrot.lane.b32.xlu0 %v791_v62, %s1590_s9 }
 0x44b   :  { %1100 = vrot.lane.b32.xlu0 %v1092_v63, %s1591_s18 }
 0x458   :  { %v2007_v0 = vpop.permute.xlu1 %834 }
 0x459   :  { %v2009_v53 = vpop.permute.xlu0 %796 }
 0x45c   :  { %v2011_v16 = vpop.permute.xlu1 %910 }
 0x45d   :  { %v2013_v6 = vpop.permute.xlu0 %872 }
 0x460   :  { %v2015_v7 = vpop.permute.xlu1 %1024 }
 0x461   :  { %v2017_v8 = vpop.permute.xlu0 %948  ;;  %1033 = vst.msk [vmem:[#allocation2 + $0x110] sm:$0xf] %vm103_vm1, %v2015_v7 }
 0x464   :  { %v2021_v9 = vpop.permute.xlu1 %1062 }
 0x465   :  { %v2023_v10 = vpop.permute.xlu0 %811  ;;  %1071 = vst.msk [vmem:[#allocation2 + $0x138] sm:$0xf] %vm103_vm1, %v2021_v9 }
 0x468   :  { %v2027_v11 = vpop.permute.xlu1 %986 }
 0x469   :  { %v854_v12 = vpop.permute.xlu0 %853 }
 0x46a   :  { %862 = vst.msk [vmem:[#allocation2 + $0x60] sm:$0xf] %vm80_vm0, %v854_v12 }
 0x46c   :  { %v816_v13 = vpop.permute.xlu1 %815 }
 0x46d   :  { %v892_v14 = vpop.permute.xlu0 %891  ;;  %824 = vst.msk [vmem:[#allocation2 + $0x38] sm:$0xf] %vm80_vm0, %v816_v13 }
 0x46e   :  { %900 = vst.msk [vmem:[#allocation2 + $0x88] sm:$0xf] %vm80_vm0, %v892_v14 }
 0x470   :  { %v850_v15 = vpop.permute.xlu1 %849 }
 0x471   :  { %v888_v17 = vpop.permute.xlu0 %887 }
 0x474   :  { %v926_v18 = vpop.permute.xlu1 %925 }
 0x475   :  { %v930_v19 = vpop.permute.xlu0 %929 }
 0x476   :  { %938 = vst.msk [vmem:[#allocation2 + $0xb0] sm:$0xf] %vm80_vm0, %v930_v19 }
 0x478   :  { %v1002_v25 = vpop.permute.xlu1 %1001 }
 0x479   :  { %v968_v26 = vpop.permute.xlu0 %967 }
 0x47a   :  { %976 = vst.msk [vmem:[#allocation2 + $0xd8] sm:$0xf] %vm80_vm0, %v968_v26 }
 0x47c   :  { %v2034_v27 = vpop.permute.xlu1 %1077 }
 0x47d   :  { %v964_v4 = vpop.permute.xlu0 %963 }
 0x480   :  { %v2036_v5 = vpop.permute.xlu1 %1081 }
 0x481   :  { %v1006_v23 = vpop.permute.xlu0 %1005  ;;  %1090 = vst.msk [vmem:[#allocation2 + $0x150] sm:$0xf] %vm80_vm0, %v2036_v5 }
 0x482   :  { %1014 = vst.msk [vmem:[#allocation2 + $0x100] sm:$0xf] %vm80_vm0, %v1006_v23 }
 0x484   :  { %v2041_v24 = vpop.permute.xlu1 %792 }
 0x485   :  { %v1044_v28 = vpop.permute.xlu0 %1043  ;;  %803 = vst.msk [vmem:[#allocation2 + $0x10] sm:$0xf] %vm100_vm9, %v2041_v24 }
 0x486   :  { %1052 = vst.msk [vmem:[#allocation2 + $0x128] sm:$0xf] %vm80_vm0, %v1044_v28 }
 0x488   :  { %v2046_v29 = vpop.permute.xlu1 %830 }
 0x489   :  { %v1040_v30 = vpop.permute.xlu0 %1039  ;;  %841 = vst.msk [vmem:[#allocation2 + $0x38] sm:$0xf] %vm100_vm9, %v2046_v29 }
 0x48c   :  { %v852_v31 = vpop.permute.xlu1 %851 }
 0x48d   :  { %v869_v32 = vpop.permute.xlu0 %868  ;;  %v855_v33 = vsel %vm156_vm3, %v850_v15, %v852_v31  ;;  %v856_v34 = vsel %vm156_vm3, %v852_v31, %v854_v12  ;;  %vm2236_vm3 = vcmask 744448  }
 0x48e   :  { %879 = vst.msk [vmem:[#allocation2 + $0x60] sm:$0xf] %vm100_vm9, %v869_v32  ;;  %860 = vst [vmem:[#allocation2 + $0x50] sm:$0xf] %v855_v33 }
 0x48f   :  { %861 = vst [vmem:[#allocation2 + $0x58] sm:$0xf] %v856_v34 }
 0x490   :  { %v890_v35 = vpop.permute.xlu1 %889 }
 0x491   :  { %v907_v36 = vpop.permute.xlu0 %906  ;;  %v893_v37 = vsel %vm196_vm4, %v888_v17, %v890_v35  ;;  %v894_v38 = vsel %vm196_vm4, %v890_v35, %v892_v14  ;;  %vm2237_vm4 = vmmov %vm2236_vm3 }
 0x492   :  { %917 = vst.msk [vmem:[#allocation2 + $0x88] sm:$0xf] %vm100_vm9, %v907_v36  ;;  %898 = vst [vmem:[#allocation2 + $0x78] sm:$0xf] %v893_v37 }
 0x493   :  { %899 = vst [vmem:[#allocation2 + $0x80] sm:$0xf] %v894_v38 }
 0x494   :  { %v928_v39 = vpop.permute.xlu1 %927 }
 0x495   :  { %v2056_v40 = vpop.permute.xlu0 %944  ;;  %v931_v41 = vsel %vm236_vm5, %v926_v18, %v928_v39  ;;  %v932_v42 = vsel %vm236_vm5, %v928_v39, %v930_v19  ;;  %v1121_v31 = vld [vmem:[#allocation2 + $0x50] sm:$0xff] }
 0x496   :  { %955 = vst.msk [vmem:[#allocation2 + $0xb0] sm:$0xf] %vm100_vm9, %v2056_v40  ;;  %936 = vst [vmem:[#allocation2 + $0xa0] sm:$0xf] %v931_v41  ;;  %v1122_v19 = vld [vmem:[#allocation2 + $0x58] sm:$0xff] }
 0x497   :  { %937 = vst [vmem:[#allocation2 + $0xa8] sm:$0xf] %v932_v42 }
 0x498   :  { %v966_v43 = vpop.permute.xlu1 %965 }
 0x499   :  { %v2062_v44 = vpop.permute.xlu0 %982  ;;  %v969_v45 = vsel %vm276_vm6, %v964_v4, %v966_v43  ;;  %v970_v46 = vsel %vm276_vm6, %v966_v43, %v968_v26  ;;  %vm2238_vm6 = vcmask 244736   ;;  %v1126_v4 = vld [vmem:[#allocation2 + $0x78] sm:$0xff] }
 0x49a   :  { %993 = vst.msk [vmem:[#allocation2 + $0xd8] sm:$0xf] %vm100_vm9, %v2062_v44  ;;  %974 = vst [vmem:[#allocation2 + $0xc8] sm:$0xf] %v969_v45  ;;  %v1127_v15 = vld [vmem:[#allocation2 + $0x80] sm:$0xff] }
 0x49b   :  { %975 = vst [vmem:[#allocation2 + $0xd0] sm:$0xf] %v970_v46  ;;  %v1162_v26 = vpack.c.bf16 %v1127_v15, %v1122_v19 }
 0x49c   :  { %v1004_v47 = vpop.permute.xlu1 %1003 }
 0x49d   :  { %v814_v48 = vpop.permute.xlu0 %813  ;;  %v1007_v49 = vsel %vm316_vm7, %v1002_v25, %v1004_v47  ;;  %v1008_v50 = vsel %vm316_vm7, %v1004_v47, %v1006_v23  ;;  %vm2240_vm7 = vcmask 736256   ;;  %v1131_v41 = vld [vmem:[#allocation2 + $0xa0] sm:$0xff] }
 0x49e   :  { %v817_v51 = vsel %vm116_vm2, %v2023_v10, %v814_v48  ;;  %v818_v52 = vsel %vm116_vm2, %v814_v48, %v816_v13  ;;  %1012 = vst [vmem:[#allocation2 + $0xf0] sm:$0xf] %v1007_v49  ;;  %1013 = vst [vmem:[#allocation2 + $0xf8] sm:$0xf] %v1008_v50  ;;  %v1132_v33 = vld [vmem:[#allocation2 + $0xa8] sm:$0xff] }
 0x49f   :  { %822 = vst [vmem:[#allocation2 + $0x28] sm:$0xf] %v817_v51  ;;  %823 = vst [vmem:[#allocation2 + $0x30] sm:$0xf] %v818_v52 }
 0x4a0   :  { %v1042_v54 = vpop.permute.xlu1 %1041  ;;  %vm2239_vm2 = vmmov %vm2238_vm6 }
 0x4a1   :  { %v2073_v55 = vpop.permute.xlu0 %1020  ;;  %v1045_v56 = vsel %vm2236_vm3, %v1040_v30, %v1042_v54  ;;  %v1046_v57 = vsel %vm2237_vm4, %v1042_v54, %v1044_v28  ;;  %vm2241_vm8 = vmmov %vm2240_vm7  ;;  %vm2248_vm4 = vcmask 252928  }
 0x4a2   :  { %1050 = vst [vmem:[#allocation2 + $0x118] sm:$0xf] %v1045_v56  ;;  %1051 = vst [vmem:[#allocation2 + $0x120] sm:$0xf] %v1046_v57  ;;  %v1137_v30 = vld [vmem:[#allocation2 + $0xd0] sm:$0xff]  ;;  %v1118_v57 = vld [vmem:[#allocation2 + $0x38] sm:$0xff] }
 0x4a3   :  { %v1167_v35 = vpack.c.bf16 %v1137_v30, %v1132_v33  ;;  %vm2247_vm3 = vmmov %vm2246_vm12  ;;  %v1138_v30 = vld [vmem:[#allocation2 + $0xd8] sm:$0xff]  ;;  %v1133_v33 = vld [vmem:[#allocation2 + $0xb0] sm:$0xff] }
 0x4a4   :  { %v871_v58 = vpop.permute.xlu1 %870 }
 0x4a5   :  { %v1080_v59 = vpop.permute.xlu0 %1079  ;;  %v874_v62 = vsel %vm2238_vm6, %v869_v32, %v871_v58  ;;  %v875_v63 = vsel %vm2239_vm2, %v871_v58, %v2013_v6  ;;  %v1161_v32 = vpack.c.bf16 %v1126_v4, %v1121_v31  ;;  %vm2249_vm6 = vmmov %vm2248_vm4  ;;  %v1142_v42 = vld [vmem:[#allocation2 + $0xf8] sm:$0xff]  ;;  %vm2250_vm2 = vcmask 97280   ;;  %v1141_v49 = vld [vmem:[#allocation2 + $0xf0] sm:$0xff] }
 0x4a6   :  { %v1083_v10 = vsel %vm2240_vm7, %v2034_v27, %v1080_v59  ;;  %v1084_v12 = vsel %vm2241_vm8, %v1080_v59, %v2036_v5  ;;  %v1117_v13 = vld [vmem:[#allocation2 + $0x30] sm:$0xff]  ;;  %v1116_v14 = vld [vmem:[#allocation2 + $0x28] sm:$0xff]  ;;  %880 = vst [vmem:[#allocation2 + $0x68] sm:$0xf] %v874_v62  ;;  %881 = vst.msk [vmem:[#allocation2 + $0x70] sm:$0xf] %vm103_vm1, %v875_v63 }
 0x4a7   :  { %1088 = vst [vmem:[#allocation2 + $0x140] sm:$0xf] %v1083_v10  ;;  %1089 = vst [vmem:[#allocation2 + $0x148] sm:$0xf] %v1084_v12  ;;  %v1157_v17 = vpack.c.bf16 %v1117_v13, %v1112_v60  ;;  %v1156_v18 = vpack.c.bf16 %v1116_v14, %v1111_v61  ;;  %vm2252_vm8 = vcmask 1014784   ;;  %v1113_v62 = vld [vmem:[#allocation2 + $0x10] sm:$0xff] }
 0x4a8   :  { %v909_v25 = vpop.permute.xlu1 %908  ;;  %vm2251_vm7 = vmmov %vm2250_vm2  ;;  %v1158_v63 = vpack.c.bf16 %v1118_v57, %v1113_v62 }
 0x4a9   :  { %1199 = vmatprep.subr.bf16.mxu1 %v1157_v17  ;;  %v795_v6 = vpop.permute.xlu0 %794  ;;  %v912_v27 = vsel %vm2242_vm10, %v907_v36, %v909_v25  ;;  %v913_v5 = vsel %vm2243_vm11, %v909_v25, %v2011_v16  ;;  %v1136_v36 = vld [vmem:[#allocation2 + $0xc8] sm:$0xff]  ;;  %v1147_v39 = vld [vmem:[#allocation2 + $0x120] sm:$0xff]  ;;  %v1146_v46 = vld [vmem:[#allocation2 + $0x118] sm:$0xff]  ;;  %vm2254_vm11 = vcmask 998400  }
 0x4aa   :  { %v798_v23 = vsel %vm2244_vm13, %v2041_v24, %v795_v6  ;;  %v799_v28 = vsel %vm2245_vm14, %v795_v6, %v2009_v53  ;;  %1200 = vmatpush1.bf16.msra.mxu1 %v1156_v18  ;;  %918 = vst [vmem:[#allocation2 + $0x90] sm:$0xf] %v912_v27  ;;  %919 = vst.msk [vmem:[#allocation2 + $0x98] sm:$0xf] %vm103_vm1, %v913_v5  ;;  %v1172_v45 = vpack.c.bf16 %v1147_v39, %v1142_v42  ;;  %vm2255_vm13 = vcmask 1006592  }
 0x4ab   :  { %804 = vst [vmem:[#allocation2 + $0x18] sm:$0xf] %v798_v23  ;;  %805 = vst.msk [vmem:[#allocation2 + $0x20] sm:$0xf] %vm103_vm1, %v799_v28  ;;  %1201 = vmatprep.subr.bf16.mxu1 %v1162_v26  ;;  %v1171_v50 = vpack.c.bf16 %v1146_v46, %v1141_v49  ;;  %v1110_v25 = vld [vmem:[%s2221_s2] sm:$0x3] }
 0x4ac   :  { %v947_v34 = vpop.permute.xlu1 %946  ;;  %vm2253_vm10 = vmmov %vm2252_vm8  ;;  %v1123_v26 = vld [vmem:[#allocation2 + $0x60] sm:$0xff] }
 0x4ad   :  { %v833_v16 = vpop.permute.xlu0 %832  ;;  %v950_v24 = vsel %vm2246_vm12, %v2056_v40, %v947_v34  ;;  %v951_v53 = vsel %vm2247_vm3, %v947_v34, %v2017_v8  ;;  %v1166_v40 = vpack.c.bf16 %v1136_v36, %v1131_v41  ;;  %v1124_v10 = vld [vmem:[#allocation2 + $0x68] sm:$0xff]  ;;  %vm2256_vm14 = vmmov %vm2255_vm13  ;;  %vm2257_vm12 = vcmask 588800   ;;  %v1125_v34 = vld [vmem:[#allocation2 + $0x70] sm:$0xff] }
 0x4ae   :  { %v836_v37 = vsel %vm2248_vm4, %v2046_v29, %v833_v16  ;;  %v837_v38 = vsel %vm2249_vm6, %v833_v16, %v2007_v0  ;;  %1202 = vmatpush1.bf16.msra.mxu1 %v1161_v32  ;;  %956 = vst [vmem:[#allocation2 + $0xb8] sm:$0xf] %v950_v24  ;;  %957 = vst.msk [vmem:[#allocation2 + $0xc0] sm:$0xf] %vm103_vm1, %v951_v53  ;;  %v1152_v47 = vld [vmem:[#allocation2 + $0x148] sm:$0xff]  ;;  %v1151_v48 = vld [vmem:[#allocation2 + $0x140] sm:$0xff]  ;;  %v1168_v16 = vpack.c.bf16 %v1138_v30, %v1133_v33 }
 0x4af   :  { %842 = vst [vmem:[#allocation2 + $0x40] sm:$0xf] %v836_v37  ;;  %843 = vst.msk [vmem:[#allocation2 + $0x48] sm:$0xf] %vm103_vm1, %v837_v38  ;;  %1203 = vmatprep.subr.bf16.mxu1 %v1167_v35  ;;  %v1177_v54 = vpack.c.bf16 %v1152_v47, %v1152_v47  ;;  %v1176_v56 = vpack.c.bf16 %v1151_v48, %v1151_v48  ;;  %v1145_v47 = vld [vmem:[#allocation2 + $0x110] sm:$0xff] }
 0x4b0   :  { %v985_v43 = vpop.permute.xlu1 %984  ;;  %vm2258_vm3 = vmmov %vm2254_vm11 }
 0x4b1   :  { %v1097_v8 = vpop.permute.xlu0 %1096  ;;  %v988_v29 = vsel %vm2250_vm2, %v2062_v44, %v985_v43  ;;  %v989_v0 = vsel %vm2251_vm7, %v985_v43, %v2027_v11  ;;  %v1129_v60 = vld [vmem:[#allocation2 + $0x90] sm:$0xff]  ;;  %v1130_v31 = vld [vmem:[#allocation2 + $0x98] sm:$0xff]  ;;  %vm2260_vm4 = vmmov %vm2257_vm12 }
 0x4b2   :  { %1204 = vmatpush1.bf16.msra.mxu1 %v1166_v40  ;;  %994 = vst [vmem:[#allocation2 + $0xe0] sm:$0xf] %v988_v29  ;;  %995 = vst.msk [vmem:[#allocation2 + $0xe8] sm:$0xf] %vm103_vm1, %v989_v0  ;;  %v1114_v58 = vld [vmem:[#allocation2 + $0x18] sm:$0xff]  ;;  %v1164_v14 = vpack.c.bf16 %v1129_v60, %v1124_v10  ;;  %v1115_v4 = vld [vmem:[#allocation2 + $0x20] sm:$0xff]  ;;  %v1165_v35 = vpack.c.bf16 %v1130_v31, %v1125_v34 }
 0x4b3   :  { %1205 = vmatprep.subr.bf16.mxu1 %v1172_v45  ;;  %v1150_v45 = vld [vmem:[#allocation2 + $0x138] sm:$0xff]  ;;  %vm2261_vm6 = vmmov %vm2260_vm4 }
 0x4b4   :  { %v1059_v51 = vpop.permute.xlu1 %1058  ;;  %v1175_v48 = vpack.c.bf16 %v1150_v45, %v1145_v47  ;;  %v1321_v45 = vld [vmem:[%s2220_s4] sm:$0xf]  ;;  %v1487_v47 = vld [vmem:[%s2217_s0 + $0xc] sm:$0xff] }
 0x4b5   :  { %v1023_v52 = vpop.permute.xlu0 %1022  ;;  %v1135_v42 = vld [vmem:[#allocation2 + $0xc0] sm:$0xff] }
 0x4b6   :  { %v1026_v44 = vsel %vm2252_vm8, %v2073_v55, %v1023_v52  ;;  %v1027_v11 = vsel %vm2253_vm10, %v1023_v52, %v2015_v7  ;;  %1206 = vmatpush1.bf16.msra.mxu1 %v1171_v50  ;;  %v1119_v59 = vld [vmem:[#allocation2 + $0x40] sm:$0xff]  ;;  %v1185_v55 = vsel %vm500_vm15, %v1176_v56, 0  ;;  %v1128_v7 = vld [vmem:[#allocation2 + $0x88] sm:$0xff] }
 0x4b7   :  { %1031 = vst.msk [vmem:[#allocation2 + $0x100] sm:$0xf] %vm100_vm9, %v1026_v44  ;;  %1032 = vst [vmem:[#allocation2 + $0x108] sm:$0xf] %v1027_v11  ;;  %1482 = vmatprep.subr.msk.bf16.mxu1 %vm500_vm15, %v1177_v54  ;;  %v1159_v61 = vpack.c.bf16 %v1119_v59, %v1114_v58  ;;  %v1120_v15 = vld [vmem:[#allocation2 + $0x48] sm:$0xff]  ;;  %v1163_v27 = vpack.c.bf16 %v1128_v7, %v1123_v26 }
 0x4b8   :  { %v1099_v12 = vpop.permute.xlu1 %1098  ;;  %v1160_v5 = vpack.c.bf16 %v1120_v15, %v1115_v4 }
 0x4b9   :  { %1240 = vmatprep.subr.bf16.mxu0 %v1159_v61  ;;  %v1061_v13 = vpop.permute.xlu0 %1060  ;;  %v1102_v17 = vsel %vm2254_vm11, %v1097_v8, %v1099_v12  ;;  %v1139_v6 = vld [vmem:[#allocation2 + $0xe0] sm:$0xff]  ;;  %v1140_v53 = vld [vmem:[#allocation2 + $0xe8] sm:$0xff] }
 0x4ba   :  { %v1064_v18 = vsel %vm2255_vm13, %v1059_v51, %v1061_v13  ;;  %v1065_v19 = vsel %vm2256_vm14, %v1061_v13, %v2021_v9  ;;  %1208 = vmatpush1.bf16.msra.mxu1 %v1185_v55  ;;  %1241 = vmatpush1.bf16.msra.mxu0 %v1158_v63  ;;  %1107 = vst.msk [vmem:[#allocation2 + $0x150] sm:$0xf] %vm100_vm9, %v1102_v17  ;;  %v1134_v9 = vld [vmem:[#allocation2 + $0xb8] sm:$0xff] }
 0x4bb   :  { %1069 = vst.msk [vmem:[#allocation2 + $0x128] sm:$0xf] %vm100_vm9, %v1064_v18  ;;  %1070 = vst [vmem:[#allocation2 + $0x130] sm:$0xf] %v1065_v19  ;;  %1242 = vmatprep.subr.bf16.mxu0 %v1164_v14  ;;  %1517 = vmatprep.subr.bf16.mxu1 %v1573_v2  ;;  %v1169_v28 = vpack.c.bf16 %v1139_v6, %v1134_v9  ;;  %vm2259_vm9 = vmmov 0   ;;  %v1170_v43 = vpack.c.bf16 %v1140_v53, %v1135_v42 }
 0x4bd   :  { %1483 = vmatmul.mubr.msk.bf16.vlgmr.msra.gmra.mrb[4].mxu1 %vm2257_vm12, %v1110_v25  ;;  %v1101_v23 = vpop.permute.xlu0 %1100 }
 0x4be   :  { %v1103_v32 = vsel %vm2258_vm3, %v1099_v12, %v1101_v23  ;;  %1109 = vst.msk [vmem:[#allocation2 + $0x160] sm:$0xf] %vm103_vm1, %v1101_v23  ;;  %1243 = vmatpush1.bf16.msra.mxu0 %v1163_v27  ;;  %1518 = vmatpush3.bf16.msra.mxu1 %v1160_v5  ;;  %v1144_v36 = vld [vmem:[#allocation2 + $0x108] sm:$0xff]  ;;  %v1143_v24 = vld [vmem:[#allocation2 + $0x100] sm:$0xff] }
 0x4bf   :  { %1108 = vst [vmem:[#allocation2 + $0x158] sm:$0xf] %v1103_v32  ;;  %1244 = vmatprep.subr.bf16.mxu0 %v1169_v28  ;;  %1519 = vmatprep.subr.bf16.mxu1 %v1573_v2 }
 0x4c0   :  { %1527 = vmatprep.mubr.msk.bf16.mxu1 %vm2259_vm9, %v1573_v2 }
 0x4c1   :  { %v1153_v39 = vld [vmem:[#allocation2 + $0x150] sm:$0xff] }
 0x4c2   :  { %1245 = vmatpush1.bf16.msra.mxu0 %v1168_v16  ;;  %1520 = vmatpush3.bf16.msra.mxu1 %v1165_v35  ;;  %v1149_v37 = vld [vmem:[#allocation2 + $0x130] sm:$0xff]  ;;  %v1148_v38 = vld [vmem:[#allocation2 + $0x128] sm:$0xff]  ;;  %v1178_v8 = vpack.c.bf16 %v1153_v39, %v1153_v39 }
 0x4c3   :  { %v1174_v41 = vpack.c.bf16 %v1149_v37, %v1144_v36  ;;  %1521 = vmatprep.subr.bf16.mxu1 %v1573_v2  ;;  %v1173_v40 = vpack.c.bf16 %v1148_v38, %v1143_v24  ;;  %v1597_v24 = vmov 2  }
 0x4c4   :  { %v1191_v49 = vsel %vm500_vm15, %v1178_v8, 0  ;;  %1560 = vset.pattern.permute.xlu1 %v1597_v24  ;;  %v1598_v8 = vmov 3  }
 0x4c5   :  { %1246 = vmatprep.subr.bf16.mxu0 %v1174_v41  ;;  %v1155_v29 = vld [vmem:[#allocation2 + $0x160] sm:$0xff]  ;;  %1562 = vset.pattern.permute.xlu0 %v1598_v8 }
 0x4c6   :  { %1247 = vmatpush1.bf16.msra.mxu0 %v1173_v40  ;;  %1522 = vmatpush3.bf16.msra.mxu1 %v1170_v43  ;;  %v1154_v46 = vld [vmem:[#allocation2 + $0x158] sm:$0xff]  ;;  %v1180_v50 = vpack.c.bf16 %v1155_v29, %v1155_v29 }
 0x4c7   :  { %v1179_v0 = vpack.c.bf16 %v1154_v46, %v1154_v46  ;;  %1523 = vmatprep.subr.bf16.mxu1 %v1573_v2 }
 0x4c8   :  { %v1197_v51 = vsel %vm500_vm15, %v1180_v50, 0 }
 0x4c9   :  { %1484 = vmatprep.subr.msk.bf16.mxu0 %vm500_vm15, %v1179_v0 }
 0x4ca   :  { %1249 = vmatpush1.bf16.msra.mxu0 %v1191_v49  ;;  %1524 = vmatpush3.bf16.msra.mxu1 %v1175_v48  ;;  %v1488_v48 = vld [vmem:[%s2217_s0 + $0x14] sm:$0xf]  ;;  %v1393_v49 = vld [vmem:[%s2217_s0] sm:$0xff] }
 0x4cb   :  { %1525 = vmatprep.subr.bf16.mxu1 %v1573_v2  ;;  %v1397_v50 = vcombine.high %v1393_v49, %v1393_v49 }
 0x4cd   :  { %1485 = vmatmul.mubr.msk.bf16.vlgmr.msra.gmra.mrb[8].mxu0 %vm2260_vm4, %v1110_v25 }
 0x4ce   :  { %1526 = vmatpush3.bf16.msra.mxu1 %v1197_v51 }
 0x4d1   :  { %1528 = vmatmul.mubr.msk.bf16.vlgmr.msra.gmra.mrb[8].mxu1 %vm2261_vm6, %v1110_v25 }
 0x590   :  { %v2140_v52 = vpop.f32.mrb[4].mxu1 }
 0x591   :  { %v1322_v54 = vmul.f32 %v2140_v52, %v1910_v1  ;;  %v2144_v56 = vpop.f32.mrb[5].mxu1 }
 0x592   :  { %v1323_v57 = vmul.f32 %v2144_v56, %v1912_v3  ;;  %v1237_v44 = vpop.f32.mrb[6].mxu1 }
 0x593   :  { %v1327_v2 = vsel %vm500_vm15, %v1322_v54, 0.0  ;;  %v1338_v11 = vmul.f32 %v1322_v54, %v1322_v54  ;;  %v1238_v58 = vpop.f32.mrb[7].mxu1  ;;  %v1394_v44 = vld [vmem:[%s2217_s0 + $0x8] sm:$0xf]  ;;  %s1599_s0 = smov 96  }
 0x594   :  { %v1328_v59 = vsel %vm500_vm15, %v1323_v57, 0.0  ;;  %v1339_v60 = vmul.f32 %v1323_v57, %v1323_v57  ;;  %v1422_v57 = vcombine.high %v1487_v47, %v1487_v47 }
 0x595   :  { %v1343_v61 = vsel %vm500_vm15, %v1338_v11, 0.0  ;;  %v1329_v62 = vadd.f32 %v1328_v59, %v1327_v2 }
 0x596   :  { %v1344_v63 = vsel %vm500_vm15, %v1339_v60, 0.0 }
 0x597   :  { %v1345_v10 = vadd.f32 %v1344_v63, %v1343_v61 }
 0x5a0   :  { %v2152_v12 = vpop.f32.mrb[8].mxu0 }
 0x5a1   :  { %v1324_v13 = vmul.f32 %v2152_v12, %v1928_v21  ;;  %v2156_v55 = vpop.f32.mrb[9].mxu0 }
 0x5a2   :  { %v1325_v14 = vmul.f32 %v2156_v55, %v1930_v22  ;;  %v1278_v7 = vpop.f32.mrb[10].mxu0 }
 0x5a3   :  { %v1330_v15 = vsel %vm500_vm15, %v1324_v13, 0.0  ;;  %v1340_v17 = vmul.f32 %v1324_v13, %v1324_v13  ;;  %v1279_v18 = vpop.f32.mrb[11].mxu0 }
 0x5a4   :  { %v1331_v19 = vadd.f32 %v1330_v15, %v1329_v62  ;;  %v1332_v25 = vsel %vm500_vm15, %v1325_v14, 0.0  ;;  %v1341_v6 = vmul.f32 %v1325_v14, %v1325_v14  ;;  %v1315_v26 = vpop.f32.mrb[8].mxu1 }
 0x5a5   :  { %v1346_v4 = vsel %vm500_vm15, %v1340_v17, 0.0  ;;  %v1326_v27 = vmul.f32 %v1315_v26, %v1926_v20  ;;  %v1529_v5 = vpop.f32.mrb[9].mxu1 }
 0x5a6   :  { %v1347_v9 = vadd.f32 %v1346_v4, %v1345_v10  ;;  %v1333_v23 = vadd.f32 %v1332_v25, %v1331_v19  ;;  %v1348_v28 = vsel %vm500_vm15, %v1341_v6, 0.0  ;;  %v1318_v30 = vpop.f32.mrb[10].mxu1 }
 0x5a7   :  { %v1334_v31 = vsel %vm103_vm1, %v1326_v27, 0.0  ;;  %v1342_v32 = vmul.f32 %v1326_v27, %v1326_v27  ;;  %v1530_v33 = vpop.f32.mrb[11].mxu1 }
 0x5a8   :  { %v1335_v34 = vadd.f32 %v1334_v31, %v1333_v23  ;;  %v1349_v16 = vadd.f32 %v1348_v28, %v1347_v9 }
 0x5a9   :  { %v1350_v35 = vsel %vm103_vm1, %v1342_v32, 0.0  ;;  %vm2262_vm1 = vcmask 105472  }
 0x5aa   :  { %1336 = vadd.xlane.f32.xlu1 %v1335_v34  ;;  %v1351_v36 = vadd.f32 %v1350_v35, %v1349_v16  ;;  %vm2263_vm2 = vmmov %vm2262_vm1 }
 0x5ac   :  { %1352 = vadd.xlane.f32.xlu0 %v1351_v36 }
 0x637   :  { %v1337_v53 = vpop.xlane.xlu1 %1336 }
 0x638   :  { %v1354_v37 = vmul.f32 0.001953125, %v1337_v53 }
 0x639   :  { %v1353_v38 = vpop.xlane.xlu0 %1352 }
 0x63a   :  { %v1356_v39 = vmul.f32 %v1354_v37, %v1354_v37  ;;  %v1355_v41 = vmul.f32 0.001953125, %v1353_v38 }
 0x63c   :  { %v1357_v40 = vsub.f32 %v1355_v41, %v1356_v39 }
 0x63e   :  { %v1358_v42 = vmax.f32 %v1357_v40, 0.0 }
 0x640   :  { %v1359_v43 = vadd.f32 1e-05, %v1358_v42 }
 0x642   :  { %1571 = vrsqrt.f32 %v1359_v43 }
 0x64c   :  { %v1572_v46 = vpop.eup %1571 }
 0x64d   :  { %v1361_v29 = vmul.f32 %v1572_v46, %v1321_v45 }
 0x64f   :  { %1370 = vperm.xlu1 %1560, %v1361_v29   ;;  %v1362_v0 = vmul.f32 %v1361_v29, %v1354_v37 }
 0x651   :  { %1364 = vrot.lane.b32.xlu0 %v1362_v0, %s1593_s16 }
 0x653   :  { %1561 = vset.pattern.permute.xlu1 %v1598_v8 }
 0x655   :  { %1423 = vrot.lane.b32.xlu0 %v1487_v47, %s1587_s12 }
 0x659   :  { %1427 = vrot.lane.b32.xlu0 %v1488_v48, %s1587_s12 }
 0x65d   :  { %1400 = vrot.lane.b32.xlu0 %v1397_v50, %s1577_s29 }
 0x6c3   :  { %v1365_v51 = vpop.permute.xlu0 %1364 }
 0x6c4   :  { %v1367_v54 = vsub.f32 %v1321_v45, %v1365_v51 }
 0x6c6   :  { %1380 = vperm.xlu1 %1561, %v1367_v54  }
 0x6c7   :  { %v1424_v11 = vpop.permute.xlu0 %1423 }
 0x6ca   :  { %1425 = vrot.lane.b32.xlu1 %v1422_v57, %s1587_s12 }
 0x6cb   :  { %v1428_v13 = vpop.permute.xlu0 %1427 }
 0x6ce   :  { %1398 = vrot.lane.b32.xlu1 %v1393_v49, %s1577_s29  ;;  %v1371_v2 = vpop.permute.xlu1 %1370 }
 0x6cf   :  { %v1376_v58 = vmul.f32 %v1371_v2, %v2156_v55  ;;  %v1377_v59 = vmul.f32 %v1371_v2, %v1315_v26  ;;  %v1375_v60 = vmul.f32 %v1371_v2, %v2152_v12  ;;  %v1373_v25 = vmul.f32 %v1371_v2, %v2140_v52 }
 0x6d0   :  { %v1374_v12 = vmul.f32 %v1371_v2, %v2144_v56 }
 0x6d2   :  { %1402 = vrot.lane.b32.xlu1 %v1394_v44, %s1577_s29 }
 0x745   :  { %v1381_v61 = vpop.permute.xlu1 %1380 }
 0x746   :  { %v1385_v62 = vadd.f32 %v1381_v61, %v1375_v60  ;;  %v1386_v63 = vadd.f32 %v1381_v61, %v1376_v58  ;;  %v1387_v10 = vadd.f32 %v1381_v61, %v1377_v59  ;;  %v1384_v5 = vadd.f32 %v1381_v61, %v1374_v12 }
 0x748   :  { %v1390_v14 = vmul.f32 %v1385_v62, %v1928_v21  ;;  %v1391_v7 = vmul.f32 %v1386_v63, %v1930_v22  ;;  %v1392_v15 = vmul.f32 %v1387_v10, %v1926_v20  ;;  %v1383_v21 = vadd.f32 %v1381_v61, %v1373_v25  ;;  %v1401_v22 = vpop.permute.xlu0 %1400 }
 0x749   :  { %v1426_v17 = vpop.permute.xlu1 %1425  ;;  %v1389_v23 = vmul.f32 %v1384_v5, %v1912_v3 }
 0x74a   :  { %v1434_v18 = vadd.f32 %v1424_v11, %v1390_v14  ;;  %v1429_v19 = vsel %vm2262_vm1, %v1424_v11, %v1426_v17  ;;  %v1430_v55 = vsel %vm2263_vm2, %v1426_v17, %v1428_v13  ;;  %v1388_v9 = vmul.f32 %v1383_v21, %v1910_v1 }
 0x74b   :  { %v1435_v6 = vadd.f32 %v1429_v19, %v1391_v7  ;;  %v1436_v26 = vadd.f32 %v1430_v55, %v1392_v15 }
 0x74d   :  { %v1440_v4 = vcombine.low %v1434_v18, %v1435_v6  ;;  %v1399_v27 = vpop.permute.xlu1 %1398  ;;  %1443 = vrot.lane.b32.xlu1 %v1436_v26, %s1599_s0 }
 0x74e   :  { %v1404_v20 = vsel %vm236_vm5, %v1399_v27, %v1401_v22 }
 0x74f   :  { %1441 = vrot.lane.b32.xlu0 %v1440_v4, %s1599_s0  ;;  %v1409_v30 = vadd.f32 %v1404_v20, %v1388_v9 }
 0x751   :  { %v1403_v28 = vpop.permute.xlu1 %1402 }
 0x752   :  { %v1405_v52 = vsel %vm236_vm5, %v1401_v22, %v1403_v28  ;;  %v1411_v56 = vadd.f32 %v1403_v28, %v1390_v14  ;;  %vm1448_vm5 = vcmask 785408  }
 0x753   :  { %v1410_v31 = vadd.f32 %v1405_v52, %v1389_v23 }
 0x754   :  { %1417 = vst.msk [vmem:[%s2222_s5 + $0x8] sm:$0xf] %vm80_vm0, %v1411_v56 }
 0x755   :  { %v1414_v32 = vcombine.low %v1409_v30, %v1410_v31 }
 0x757   :  { %1416 = vst [vmem:[%s2222_s5] sm:$0xff] %v1414_v32 }
 0x7bf   :  { %v1444_v33 = vpop.permute.xlu1 %1443 }
 0x7c0   :  { %1490 = vst.msk [vmem:[%s2222_s5 + $0x14] sm:$0xf] %vm80_vm0, %v1444_v33  ;;  %v1446_v3 = vrot.slane %v1444_v33, 4 }
 0x7c1   :  { %v1442_v1 = vpop.permute.xlu0 %1441 }
 0x7c2   :  { %v1445_v34 = vrot.slane %v1442_v1, 4 }
 0x7c4   :  { %v1447_v16 = vsel %vm500_vm15, %v1445_v34, %v1446_v3 }
 0x7c5   :  { %v1449_v35 = vsel %vm1448_vm5, %v1442_v1, %v1447_v16 }
 0x7c6   :  { %1489 = vst [vmem:[%s2222_s5 + $0xc] sm:$0xff] %v1449_v35 }

</bundles_post_ra>
